<compile_context>
chip_gen: v5e
topology: v5e:2x2
jax: 0.10.0
libtpu: 0.0.40
codegen_flags: <defaults>
</compile_context>

<pallas_src>
import jax
import jax.numpy as jnp
from jax import lax
from jax.experimental import pallas as pl
from jax.experimental.pallas import tpu as pltpu

CHI = 4.0
GAMMA = 0.2
B_TILE = 8   # batch rows per grid step (multiple of the 8-sublane vreg height)


def _ista_layers_kernel(params_ref, x0_ref, c_ref, g_ref, o_ref):
    """All ISTA layers for one tile of B_TILE batch elements.

    params_ref : SMEM (2*L,)        [relu(gamma)_l | relu(gamma)_l * relu(chi)_l]
    x0_ref     : VMEM (bt, 1, n)    initial iterates (row vectors)
    c_ref      : VMEM (bt, 1, n)    c = H^T z  (precomputed per element)
    g_ref      : VMEM (bt, n, n)    G = H^T H  (precomputed per element)
    o_ref      : VMEM (bt, 1, n)    final iterates
    """
    n_layers = params_ref.shape[0] // 2
    G = g_ref[...]            # (bt, n, n), resident across all layers
    c = c_ref[...]            # (bt, 1, n)

    def layer(l, x):          # x: (bt, 1, n)
        gamma = params_ref[l]
        lam = params_ref[n_layers + l]          # gamma * chi (threshold level)
        # Batched matvec on the MXU: xG[b] = x[b] @ G[b].
        xG = jnp.einsum('bqk,bkj->bqj', x, G,
                        preferred_element_type=jnp.float32)
        # x + bk  with  bk = -gamma * H^T (H x - z) = -gamma * (x G - c)
        v = x - gamma * (xG - c)
        # prox_primal: L1 soft-threshold (lam >= 0 is guaranteed by host ReLU).
        return v - jnp.clip(v, -lam, lam)

    o_ref[...] = lax.fori_loop(0, n_layers, layer, x0_ref[...], unroll=True)


def ista_forward(x0, z, H, gammas, chis, *, b_tile=B_TILE):
    """x0: (B, n), z: (B, m), H: (B, m, n), gammas/chis: (L,) -> (B, n)."""
    B, n = x0.shape
    L = int(gammas.shape[0])

    # nn.ReLU on the scalar parameters, flattened into a 1-D SMEM table.
    g = jnp.maximum(gammas, 0.0).astype(jnp.float32)
    ch = jnp.maximum(chis, 0.0).astype(jnp.float32)
    params = jnp.concatenate([g, g * ch])                      # (2L,)

    # Hoisted Gram prologue: one batched XLA matmul fills the MXU across B and
    # drops H from the kernel entirely.
    Hf = H.astype(jnp.float32)
    G = jnp.einsum('bmn,bmk->bnk', Hf, Hf,
                   precision=lax.Precision.HIGHEST)            # (B, n, n)
    c = jnp.einsum('bm,bmn->bn', z.astype(jnp.float32), Hf,
                   precision=lax.Precision.HIGHEST)            # (B, n)

    # Pad batch to a multiple of b_tile so every grid step is dense.
    n_tiles = pl.cdiv(B, b_tile)
    B_pad = n_tiles * b_tile
    if B_pad != B:
        x0 = jnp.pad(x0, ((0, B_pad - B), (0, 0)))
        c = jnp.pad(c, ((0, B_pad - B), (0, 0)))
        G = jnp.pad(G, ((0, B_pad - B), (0, 0), (0, 0)))

    x0_3 = x0.astype(jnp.float32)[:, None, :]                  # (B_pad, 1, n)
    c_3 = c[:, None, :]                                        # (B_pad, 1, n)

    cost = pl.CostEstimate(
        flops=int(B_pad) * L * (2 * n * n + 6 * n),
        transcendentals=0,
        bytes_accessed=int(B_pad) * 4 * (n * n + 3 * n) + 8 * L,
    )

    out = pl.pallas_call(
        _ista_layers_kernel,
        out_shape=jax.ShapeDtypeStruct((B_pad, 1, n), jnp.float32),
        grid=(n_tiles,),
        in_specs=[
            pl.BlockSpec(memory_space=pltpu.MemorySpace.SMEM),       # params
            pl.BlockSpec((b_tile, 1, n), lambda b: (b, 0, 0)),       # x0
            pl.BlockSpec((b_tile, 1, n), lambda b: (b, 0, 0)),       # c = H^T z
            pl.BlockSpec((b_tile, n, n), lambda b: (b, 0, 0)),       # G = H^T H
        ],
        out_specs=pl.BlockSpec((b_tile, 1, n), lambda b: (b, 0, 0)),
        compiler_params=pltpu.CompilerParams(
            dimension_semantics=("parallel",),
            vmem_limit_bytes=48 * 1024 * 1024,
        ),
        cost_estimate=cost,
    )(params, x0_3, c_3, G)

    return out[:B, 0, :]


class ISTAPallas:
    """JAX/Pallas port of the PyTorch ISTA module (tensor-H path)."""

    def __init__(self, n, m, n_layers, init_factor=1.0):
        self.n = n
        self.m = m
        self.n_layers = n_layers
        # Deterministic parameter init, mirroring ISTALayer.__init__.
        self.chis = jnp.full((n_layers,), CHI * init_factor, dtype=jnp.float32)
        self.gammas = jnp.full((n_layers,), GAMMA * init_factor, dtype=jnp.float32)

    def __call__(self, z, H, key):
        # x = torch.randn(B, n) in the reference (fresh random iterate).
        x0 = jax.random.normal(key, (z.shape[0], self.n), dtype=jnp.float32)
        return ista_forward(x0, z, H, self.gammas, self.chis)


if __name__ == "__main__":
    key = jax.random.PRNGKey(0)
    k_h, k_z, k_x = jax.random.split(key, 3)

    B, n, m, n_layers = 16, 128, 256, 4
    H = jax.random.normal(k_h, (B, m, n), dtype=jnp.float32) / jnp.sqrt(float(m))
    z = jax.random.normal(k_z, (B, m), dtype=jnp.float32)

    model = ISTAPallas(n=n, m=m, n_layers=n_layers, init_factor=1.0)
    out = model(z, H, k_x)
    jax.block_until_ready(out)

    # Pure-JAX reference of the layer-by-layer math, exactly as in PyTorch.
    def ref_forward(x0, z, H, gammas, chis):
        x = x0
        for l in range(n_layers):
            g = jnp.maximum(gammas[l], 0.0)
            lam = g * jnp.maximum(chis[l], 0.0)
            temp = jnp.einsum('bmn,bn->bm', H, x,
                              precision=lax.Precision.HIGHEST) - z
            bk = -g * jnp.einsum('bmn,bm->bn', H, temp,
                                 precision=lax.Precision.HIGHEST)
            v = x + bk
            x = jnp.sign(v) * jnp.maximum(jnp.abs(v) - lam, 0.0)
        return x

    x0 = jax.random.normal(k_x, (B, n), dtype=jnp.float32)
    ref = ref_forward(x0, z, H, model.gammas, model.chis)

    assert out.shape == (B, n) and out.dtype == jnp.float32
    assert jnp.allclose(out, ref, atol=1e-3, rtol=1e-3)
    print("KERNEL_OK")
</pallas_src>

<mosaic_0001>
module attributes {stable_mosaic.version = 11 : i64} {
  func.func @_ista_layers_kernel(%arg0: i32, %arg1: memref<8xf32, #tpu.memory_space<smem>>, %arg2: memref<8x1x128xf32, #tpu.memory_space<vmem>>, %arg3: memref<8x1x128xf32, #tpu.memory_space<vmem>>, %arg4: memref<8x128x128xf32, #tpu.memory_space<vmem>>, %arg5: memref<8x1x128xf32, #tpu.memory_space<vmem>>) attributes {dimension_semantics = [#tpu.dimension_semantics<parallel>], iteration_bounds = array<i64: 2>, scalar_prefetch = 0 : i64, scratch_operands = 0 : i64, tpu.core_type = #tpu.core_type<tc>, window_params = [{transform_indices = @transform_0, window_bounds = array<i64: 8>}, {transform_indices = @transform_1, window_bounds = array<i64: 8, 1, 128>}, {transform_indices = @transform_2, window_bounds = array<i64: 8, 1, 128>}, {transform_indices = @transform_3, window_bounds = array<i64: 8, 128, 128>}, {transform_indices = @transform_4, window_bounds = array<i64: 8, 1, 128>}]} {
    %c0 = arith.constant 0 : index
    %c0_0 = arith.constant 0 : index
    %c0_1 = arith.constant 0 : index
    %0 = vector.load %arg4[%c0, %c0_0, %c0_1] : memref<8x128x128xf32, #tpu.memory_space<vmem>>, vector<8x128x128xf32>
    %c0_2 = arith.constant 0 : index
    %c0_3 = arith.constant 0 : index
    %c0_4 = arith.constant 0 : index
    %1 = vector.load %arg3[%c0_2, %c0_3, %c0_4] : memref<8x1x128xf32, #tpu.memory_space<vmem>>, vector<8x1x128xf32>
    %c0_5 = arith.constant 0 : index
    %c0_6 = arith.constant 0 : index
    %c0_7 = arith.constant 0 : index
    %2 = vector.load %arg2[%c0_5, %c0_6, %c0_7] : memref<8x1x128xf32, #tpu.memory_space<vmem>>, vector<8x1x128xf32>
    %c0_i32 = arith.constant 0 : i32
    %3 = arith.index_cast %c0_i32 : i32 to index
    %4 = memref.load %arg1[%3] : memref<8xf32, #tpu.memory_space<smem>>
    %c4_i32 = arith.constant 4 : i32
    %5 = arith.addi %c4_i32, %c0_i32 : i32
    %6 = arith.index_cast %5 : i32 to index
    %7 = memref.load %arg1[%6] : memref<8xf32, #tpu.memory_space<smem>>
    "tpu.trace_start"() <{level = 10 : i32, message = "bqk,bkj->bqj"}> : () -> ()
    %cst = arith.constant dense<0.000000e+00> : vector<8x1x128xf32>
    %8 = tpu.matmul %2, %0, %cst {dimension_numbers = #tpu.dot_dimension_numbers<[2], [1], [1], [2], [0, 0, 0, 1, 1, 2], [0], [0]>} : vector<8x1x128xf32>, vector<8x128x128xf32>, vector<8x1x128xf32> -> vector<8x1x128xf32>
    "tpu.trace_stop"() : () -> ()
    %9 = arith.subf %8, %1 : vector<8x1x128xf32>
    %10 = vector.broadcast %4 : f32 to vector<8x1x128xf32>
    %11 = arith.mulf %10, %9 : vector<8x1x128xf32>
    %12 = arith.subf %2, %11 : vector<8x1x128xf32>
    %cst_8 = arith.constant 0.000000e+00 : f32
    %13 = arith.subf %cst_8, %7 : f32
    %14 = vector.broadcast %13 : f32 to vector<8x1x128xf32>
    %15 = arith.maximumf %14, %12 : vector<8x1x128xf32>
    %16 = vector.broadcast %7 : f32 to vector<8x1x128xf32>
    %17 = arith.minimumf %16, %15 : vector<8x1x128xf32>
    %18 = arith.subf %12, %17 : vector<8x1x128xf32>
    %c1_i32 = arith.constant 1 : i32
    %19 = arith.index_cast %c1_i32 : i32 to index
    %20 = memref.load %arg1[%19] : memref<8xf32, #tpu.memory_space<smem>>
    %c4_i32_9 = arith.constant 4 : i32
    %21 = arith.addi %c4_i32_9, %c1_i32 : i32
    %22 = arith.index_cast %21 : i32 to index
    %23 = memref.load %arg1[%22] : memref<8xf32, #tpu.memory_space<smem>>
    "tpu.trace_start"() <{level = 10 : i32, message = "bqk,bkj->bqj"}> : () -> ()
    %cst_10 = arith.constant dense<0.000000e+00> : vector<8x1x128xf32>
    %24 = tpu.matmul %18, %0, %cst_10 {dimension_numbers = #tpu.dot_dimension_numbers<[2], [1], [1], [2], [0, 0, 0, 1, 1, 2], [0], [0]>} : vector<8x1x128xf32>, vector<8x128x128xf32>, vector<8x1x128xf32> -> vector<8x1x128xf32>
    "tpu.trace_stop"() : () -> ()
    %25 = arith.subf %24, %1 : vector<8x1x128xf32>
    %26 = vector.broadcast %20 : f32 to vector<8x1x128xf32>
    %27 = arith.mulf %26, %25 : vector<8x1x128xf32>
    %28 = arith.subf %18, %27 : vector<8x1x128xf32>
    %cst_11 = arith.constant 0.000000e+00 : f32
    %29 = arith.subf %cst_11, %23 : f32
    %30 = vector.broadcast %29 : f32 to vector<8x1x128xf32>
    %31 = arith.maximumf %30, %28 : vector<8x1x128xf32>
    %32 = vector.broadcast %23 : f32 to vector<8x1x128xf32>
    %33 = arith.minimumf %32, %31 : vector<8x1x128xf32>
    %34 = arith.subf %28, %33 : vector<8x1x128xf32>
    %c2_i32 = arith.constant 2 : i32
    %35 = arith.index_cast %c2_i32 : i32 to index
    %36 = memref.load %arg1[%35] : memref<8xf32, #tpu.memory_space<smem>>
    %c4_i32_12 = arith.constant 4 : i32
    %37 = arith.addi %c4_i32_12, %c2_i32 : i32
    %38 = arith.index_cast %37 : i32 to index
    %39 = memref.load %arg1[%38] : memref<8xf32, #tpu.memory_space<smem>>
    "tpu.trace_start"() <{level = 10 : i32, message = "bqk,bkj->bqj"}> : () -> ()
    %cst_13 = arith.constant dense<0.000000e+00> : vector<8x1x128xf32>
    %40 = tpu.matmul %34, %0, %cst_13 {dimension_numbers = #tpu.dot_dimension_numbers<[2], [1], [1], [2], [0, 0, 0, 1, 1, 2], [0], [0]>} : vector<8x1x128xf32>, vector<8x128x128xf32>, vector<8x1x128xf32> -> vector<8x1x128xf32>
    "tpu.trace_stop"() : () -> ()
    %41 = arith.subf %40, %1 : vector<8x1x128xf32>
    %42 = vector.broadcast %36 : f32 to vector<8x1x128xf32>
    %43 = arith.mulf %42, %41 : vector<8x1x128xf32>
    %44 = arith.subf %34, %43 : vector<8x1x128xf32>
    %cst_14 = arith.constant 0.000000e+00 : f32
    %45 = arith.subf %cst_14, %39 : f32
    %46 = vector.broadcast %45 : f32 to vector<8x1x128xf32>
    %47 = arith.maximumf %46, %44 : vector<8x1x128xf32>
    %48 = vector.broadcast %39 : f32 to vector<8x1x128xf32>
    %49 = arith.minimumf %48, %47 : vector<8x1x128xf32>
    %50 = arith.subf %44, %49 : vector<8x1x128xf32>
    %c3_i32 = arith.constant 3 : i32
    %51 = arith.index_cast %c3_i32 : i32 to index
    %52 = memref.load %arg1[%51] : memref<8xf32, #tpu.memory_space<smem>>
    %c4_i32_15 = arith.constant 4 : i32
    %53 = arith.addi %c4_i32_15, %c3_i32 : i32
    %54 = arith.index_cast %53 : i32 to index
    %55 = memref.load %arg1[%54] : memref<8xf32, #tpu.memory_space<smem>>
    "tpu.trace_start"() <{level = 10 : i32, message = "bqk,bkj->bqj"}> : () -> ()
    %cst_16 = arith.constant dense<0.000000e+00> : vector<8x1x128xf32>
    %56 = tpu.matmul %50, %0, %cst_16 {dimension_numbers = #tpu.dot_dimension_numbers<[2], [1], [1], [2], [0, 0, 0, 1, 1, 2], [0], [0]>} : vector<8x1x128xf32>, vector<8x128x128xf32>, vector<8x1x128xf32> -> vector<8x1x128xf32>
    "tpu.trace_stop"() : () -> ()
    %57 = arith.subf %56, %1 : vector<8x1x128xf32>
    %58 = vector.broadcast %52 : f32 to vector<8x1x128xf32>
    %59 = arith.mulf %58, %57 : vector<8x1x128xf32>
    %60 = arith.subf %50, %59 : vector<8x1x128xf32>
    %cst_17 = arith.constant 0.000000e+00 : f32
    %61 = arith.subf %cst_17, %55 : f32
    %62 = vector.broadcast %61 : f32 to vector<8x1x128xf32>
    %63 = arith.maximumf %62, %60 : vector<8x1x128xf32>
    %64 = vector.broadcast %55 : f32 to vector<8x1x128xf32>
    %65 = arith.minimumf %64, %63 : vector<8x1x128xf32>
    %66 = arith.subf %60, %65 : vector<8x1x128xf32>
    %c4_i32_18 = arith.constant 4 : i32
    %c0_19 = arith.constant 0 : index
    %c0_20 = arith.constant 0 : index
    %c0_21 = arith.constant 0 : index
    %67 = vector.load %arg5[%c0_19, %c0_20, %c0_21] : memref<8x1x128xf32, #tpu.memory_space<vmem>>, vector<8x1x128xf32>
    tpu.vector_store %arg5[%c0_19, %c0_20, %c0_21], %66 {strides = array<i32>} : memref<8x1x128xf32, #tpu.memory_space<vmem>>, vector<8x1x128xf32>,
    return
  }
  func.func @transform_0(%arg0: i32) -> i32 {
    %c0_i32 = arith.constant 0 : i32
    %c0_i32_0 = arith.constant 0 : i32
    return %c0_i32 : i32
  }
  func.func @transform_1(%arg0: i32) -> (i32, i32, i32) {
    %c0_i32 = arith.constant 0 : i32
    %c0_i32_0 = arith.constant 0 : i32
    %c0_i32_1 = arith.constant 0 : i32
    return %arg0, %c0_i32, %c0_i32_0 : i32, i32, i32
  }
  func.func @transform_2(%arg0: i32) -> (i32, i32, i32) {
    %c0_i32 = arith.constant 0 : i32
    %c0_i32_0 = arith.constant 0 : i32
    %c0_i32_1 = arith.constant 0 : i32
    return %arg0, %c0_i32, %c0_i32_0 : i32, i32, i32
  }
  func.func @transform_3(%arg0: i32) -> (i32, i32, i32) {
    %c0_i32 = arith.constant 0 : i32
    %c0_i32_0 = arith.constant 0 : i32
    %c0_i32_1 = arith.constant 0 : i32
    return %arg0, %c0_i32, %c0_i32_0 : i32, i32, i32
  }
  func.func @transform_4(%arg0: i32) -> (i32, i32, i32) {
    %c0_i32 = arith.constant 0 : i32
    %c0_i32_0 = arith.constant 0 : i32
    %c0_i32_1 = arith.constant 0 : i32
    return %arg0, %c0_i32, %c0_i32_0 : i32, i32, i32
  }
}

</mosaic_0001>

<bundles_post_ra>
// kernel: tpu_custom_call.1
= control target key start
LH: loop header
LB: loop body
LE: loop exit
PB: predicated region body
PF: predicated region fallthrough
CT: control target
= control target key end

     0   :  { %s3286_s0 = inlined_call_operand.hbm [shape: f32[8], index: 0, kind: input, shape index: {}]   ;;  %s3287_s1 = inlined_call_operand.hbm [shape: f32[16,1,128], index: 1, kind: input, shape index: {}]   ;;  %s3288_s2 = inlined_call_operand.hbm [shape: f32[16,1,128], index: 2, kind: input, shape index: {}]   ;;  %s3289_s3 = inlined_call_operand.hbm [shape: f32[16,128,128], index: 3, kind: input, shape index: {}]   ;;  %s3290_s4 = inlined_call_operand.hbm [shape: f32[16,1,128], index: 4, kind: output, shape index: {}]  }
   0x1   :  { %3460 = sst [smem:[#allocation113_spill]] %s3286_s0 }
   0x2   :  { %3461 = sst [smem:[#allocation114_spill]] %s3288_s2 }
   0x3   :  { %9 = vsyncpa [#allocation5], 0 }
   0x4   :  { %10 = vsyncpa [#allocation3], 0 }
   0x5   :  { %12 = vsyncpa [#allocation3 + $0x1], 0 }
   0x6   :  { %13 = vsyncpa [#allocation8], 0 }
   0x7   :  { %15 = vsyncpa [#allocation8 + $0x1], 0 }
   0x8   :  { %16 = vsyncpa [#allocation4], 0 }
   0x9   :  { %18 = vsyncpa [#allocation4 + $0x1], 0  ;;  %s1912_s15 = smov 0   ;;  %s1914_s16 = smov 0  }
   0xa   :  { %s1916_s17 = smov 0   ;;  %s1918_s18 = smov 0  }
   0xb LB: > { %s1933_s19 = sadd.s32 1, %s1878_s18   ;;  %s52_s20 = sadd.s32 1, %s1874_s17  ;;  %s1878_s18 = sphi %s1918_s18, %s3739_s18   ;;  %s1874_s17 = sphi %s1916_s17, %s3738_s17   ;;  %s1870_s16 = sphi %s1914_s16, %s3737_s16   ;;  %s1866_s15 = sphi %s1912_s15, %s3736_s15  }
   0xc   : > { %s49_s21 = ssub.s32 %s1878_s18, %s1933_s19  ;;  %p59_p0 = scmp.ne.s32.totalorder %s1874_s17, %s1870_s16 }
   0xd   : > { %p50_p1 = scmp.eq.s32.totalorder %s49_s21, 0  ;;  %p60_p2 = scmp.eq.s32.totalorder %s1878_s18, 0 }
   0xe   : > { %p1529_p4 = scmp.lt.s32.totalorder %s1878_s18, 2  ;;  %s1950_s23 = sand.u32 1, %s1874_s17  }
   0xf   : > { %s1944_s22 = scalar_select %p50_p1, %s1874_s17, %s52_s20  }
  0x10   : > { %p61_p5 = por %p60_p2, %p59_p0  ;;  %s1471_s24 = sshll.u32 %s1950_s23, 3 }
  0x11   : > { %3462 = sst [smem:[#allocation15_spill]] %s1944_s22  ;;  %s1472_s25 = sshll.u32 %s1878_s18, 3 }
  0x12   : > { %p1954_p6 = pnand %p1529_p4, %p61_p5  ;;  %s198_s27 = sand.u32 1, %s1878_s18  }
  0x13   : > { %s3464_s2 = sld [smem:[#allocation114_spill]]  ;;  %s202_s6 = scalar_lea.vmem [#allocation7], %s1471_s24 }
  0x14   : > { %s209_s7 = sshll.u32 %s202_s6, 4  ;;  %s1966_s8 = scalar_lea.sflag [#allocation8], %s198_s27  ;;  %s210_s7 = int_to_ptr.vmem [resolvable:$true] %s209_s7 }
  0x15   : > { %p1703_p8 = pneg %p1954_p6 }
  0x19   : > { %s206_s30 = scalar_lea.hbm %s3464_s2, %s1472_s25  ;;  %s1706_s13 = scalar_lea.hbm %s3464_s2, 16 }
  0x1a   : > { %s207_s5 = sshll.u32 %s206_s30, 4  ;;  %s208_s5 = int_to_ptr.hbm [resolvable:$true] %s207_s5 }
  0x1b   : > { %s1699_s9 = sshra.s32 %s208_s5, 4  ;;  %s1700_s9 = int_to_ptr.hbm [resolvable:$true] %s1699_s9 }
  0x1c   : > { %s1701_s10 = scalar_lea.hbm %s1700_s9, 8  ;;  %p1707_p11 = scmp.lt.s32.totalorder %s1700_s9, %s3464_s2 }
  0x1d   : > { %p1702_p7 = scmp.ne.s32.totalorder %s1700_s9, %s1701_s10  ;;  %p1708_p12 = scmp.lt.s32.totalorder %s1706_s13, %s1701_s10 }
  0x1f   : > { %p1704_p9 = pnand %p1703_p8, %p1702_p7  ;;  %p1709_p13 = por %p1708_p12, %p1707_p11 }
  0x21   : > { %p1705_p10 = pneg %p1704_p9 }
  0x23   : > { %p1710_p1 = pnand %p1709_p13, %p1705_p10 }
  0x25   : > { %1713 = shalt.err (!%p1710_p1)
}
  0x26   : > { %s3291_s21 = smov 16   ;;  %s3292_s27 = smov 1  }
  0x27   : > { %1520 = dma.hbm_to_vmem [thread:$0]  (!%p1954_p6), %s208_s5, 128, %s210_s7, %s1966_s8, %s3291_s21, %s3291_s21, %s3292_s27  }
  0x28   : > { %s1986_s28 = sadd.s32 4294967295, %s1878_s18   ;;  %s1467_s29 = sadd.s32 4294967294, %s1878_s18  }
  0x29   : > { %p65_p2 = scmp.ne.s32.totalorder %s1870_s16, %s1866_s15  ;;  %p66_p4 = scmp.eq.s32.totalorder %s1986_s28, 0 }
  0x2a   : > { %p141_p5 = scmp.eq.s32.totalorder %s1986_s28, 1  ;;  %p147_p7 = scmp.eq.s32.totalorder %s1467_s29, 1 }
  0x2b   : > { %p1995_p9 = por %p66_p4, %p65_p2  ;;  %p1468_p10 = scmp.ge.s32.totalorder %s1878_s18, 1 }
  0x2c   : > { %p2003_p11 = por %p141_p5, %p59_p0  ;;  %p2007_p12 = por %p147_p7, %p65_p2 }
  0x2d   : > { %p154_p13 = scmp.lt.s32.totalorder %s1878_s18, 3  ;;  %s3468_s0 = sld [smem:[#allocation113_spill]] }
  0x2e   : > { %s185_s14 = scalar_lea.hbm %s3287_s1, %s1472_s25  ;;  %s181_s29 = scalar_lea.vmem [#allocation6], %s1471_s24 }
  0x2f   : > { %p2015_p1 = pnand %p1468_p10, %p154_p13  ;;  %s186_s20 = sshll.u32 %s185_s14, 4  ;;  %s187_s20 = int_to_ptr.hbm [resolvable:$true] %s186_s20 }
  0x30   : > { %s188_s21 = sshll.u32 %s181_s29, 4  ;;  %s1475_s7 = sshll.u32 %s1950_s23, 10  ;;  %s189_s21 = int_to_ptr.vmem [resolvable:$true] %s188_s21 }
  0x31   : > { %p1510_p0 = pneg %p2015_p1  ;;  %s1882_s9 = smov [#allocation2]  }
  0x32   : > { %s178_s27 = scalar_lea.sflag [#allocation3], %s1950_s23  ;;  %s1751_s24 = scalar_lea.hbm %s3287_s1, 16 }
  0x33   : > { %s166_s10 = sshll.u32 %s3468_s0, 4  ;;  %p1511_p2 = pnand %p1510_p0, %p66_p4  ;;  %s167_s10 = int_to_ptr.hbm [resolvable:$true] %s166_s10 }
  0x34   : > { %s1744_s0 = sshra.s32 %s187_s20, 4  ;;  %s1745_s0 = int_to_ptr.hbm [resolvable:$true] %s1744_s0 }
  0x35   : > { %1513 = dma.hbm_to_smem (!%p1511_p2), %s167_s10, 16, %s1882_s9, [#allocation5]  }
  0x36   : > { %s1746_s2 = scalar_lea.hbm %s1745_s0, 8  ;;  %p1752_p13 = scmp.lt.s32.totalorder %s1745_s0, %s3287_s1 }
  0x37   : > { %p1747_p5 = scmp.ne.s32.totalorder %s1745_s0, %s1746_s2  ;;  %p1753_p0 = scmp.lt.s32.totalorder %s1751_s24, %s1746_s2 }
  0x39   : > { %p1749_p7 = pnand %p1747_p5, %p1703_p8  ;;  %p1754_p3 = por %p1753_p0, %p1752_p13 }
  0x3b   : > { %p1750_p10 = pneg %p1749_p7 }
  0x3d   : > { %p1755_p2 = pnand %p1754_p3, %p1750_p10 }
  0x3f   : > { %1758 = shalt.err (!%p1755_p2)
}
  0x40   : > { %s3470_s23 = smov 1   ;;  %s3471_s10 = smov 16  }
  0x41   : > { %1517 = dma.hbm_to_vmem [thread:$0]  (!%p1954_p6), %s187_s20, 128, %s189_s21, %s178_s27, %s3471_s10, %s3471_s10, %s3470_s23  }
  0x42   : > { %s1497_s29 = sshll.u32 %s1878_s18, 10  ;;  %s223_s9 = scalar_lea.vmem [#allocation9], %s1475_s7 }
  0x43   : > { %s232_s25 = sshll.u32 %s223_s9, 4  ;;  %s229_s13 = scalar_lea.hbm %s3289_s3, %s1497_s29  ;;  %s233_s25 = int_to_ptr.vmem [resolvable:$true] %s232_s25 }
  0x44   : > { %s230_s0 = sshll.u32 %s229_s13, 4  ;;  %s1781_s27 = scalar_lea.hbm %s3289_s3, 2048  ;;  %s231_s0 = int_to_ptr.hbm [resolvable:$true] %s230_s0 }
  0x45   : > { %s1774_s2 = sshra.s32 %s231_s0, 4  ;;  %s1775_s2 = int_to_ptr.hbm [resolvable:$true] %s1774_s2 }
  0x46   : > { %s1776_s24 = scalar_lea.hbm %s1775_s2, 1024  ;;  %p1782_p10 = scmp.lt.s32.totalorder %s1775_s2, %s3289_s3 }
  0x47   : > { %p1777_p3 = scmp.ne.s32.totalorder %s1775_s2, %s1776_s24  ;;  %p1783_p13 = scmp.lt.s32.totalorder %s1781_s27, %s1776_s24 }
  0x49   : > { %p1779_p5 = pnand %p1777_p3, %p1703_p8  ;;  %p1784_p0 = por %p1783_p13, %p1782_p10 }
  0x4b   : > { %p1780_p7 = pneg %p1779_p5 }
  0x4d   : > { %p1785_p2 = pnand %p1784_p0, %p1780_p7 }
  0x4f   : > { %1788 = shalt.err (!%p1785_p2)
}
  0x50   : > { %s1883_s22 = smov 128   ;;  %s1884_s23 = smov 8  }
  0x51   : > { %1523 = dma.hbm_to_vmem [thread:$0]  (!%p1954_p6), %s231_s0, 16384, %s233_s25, %s1966_s8, %s1883_s22, %s1883_s22, %s1884_s23  }
  0x52   : > { %244 = sbr.rel (%p2015_p1) target bundleno = 776 (0x308), region = 36 }
  0x57   : > { %1849 = dma.done.wait (%p66_p4), [#allocation5], 16  }
  0x58   : > { %1851 = vsyncadd (%p66_p4), [#allocation5], 4294967280  ;;  %s2069_s10 = sand.u32 1, %s1870_s16  }
  0x59   : > { %s2072_s29 = sshll.u32 %s2069_s10, 3  ;;  %s252_s26 = scalar_lea.sflag [#allocation3], %s2069_s10 }
  0x5a   : > { %s2076_s8 = scalar_lea.vmem [#allocation6], %s2072_s29 }
  0x5b   : > { %1853 = dma.done.wait (%p1995_p9), %s252_s26, 128  }
  0x5c   : > { %1855 = vsyncadd (%p1995_p9), %s252_s26, 4294967168  ;;  %s261_s11 = sand.u32 1, %s1986_s28   ;;  %s2084_s25 = scalar_lea.vmem [#allocation7], %s2072_s29 }
  0x5d   : > { %s262_s9 = scalar_lea.sflag [#allocation8], %s261_s11 }
  0x5e   : > { %1857 = dma.done.wait (%p1995_p9), %s262_s9, 16512  }
  0x5f   : > { %1859 = vsyncadd (%p1995_p9), %s262_s9, 4294950784  ;;  %s1483_s12 = sshll.u32 %s2069_s10, 10 }
  0x60   : > { %s2091_s13 = scalar_lea.vmem [#allocation9], %s1483_s12 }
  0x61   : > { %281 = sfence }
  0x62   : > { %v2094_v0 = vld [vmem:[%s2091_s13 + $0x78] sm:$0xff]  ;;  %v2108_v4 = vld [vmem:[%s2091_s13 + $0x70] sm:$0xff]  ;;  %v2122_v8 = vld [vmem:[%s2091_s13 + $0x68] sm:$0xff]  ;;  %s460_s30 = sld [smem:[#allocation2]] }
  0x63   : > { %v2097_v1 = vld [vmem:[%s2091_s13 + $0xf8] sm:$0xff]  ;;  %462 = vmatpush.msra.mxu0 %v2094_v0  ;;  %v2111_v5 = vld [vmem:[%s2091_s13 + $0xf0] sm:$0xff]  ;;  %v2127_v9 = vld [vmem:[%s2091_s13 + $0xe8] sm:$0xff]  ;;  %s1485_s0 = sld [smem:[#allocation2 + $0x4]] }
  0x64   : > { %v2100_v2 = vld [vmem:[%s2091_s13 + $0x178] sm:$0xff]  ;;  %482 = vmatpush.msra.mxu1 %v2097_v1  ;;  %v2116_v6 = vld [vmem:[%s2091_s13 + $0x170] sm:$0xff]  ;;  %v2130_v10 = vld [vmem:[%s2091_s13 + $0x168] sm:$0xff]  ;;  %s1486_s24 = sld [smem:[#allocation2 + $0x1]] }
  0x65   : > { %v2105_v3 = vld [vmem:[%s2091_s13 + $0x1f8] sm:$0xff]  ;;  %502 = vmatpush.msra.mxu2 %v2100_v2  ;;  %v2119_v7 = vld [vmem:[%s2091_s13 + $0x1f0] sm:$0xff]  ;;  %463 = vmatpush.msra.mxu0 %v2108_v4  ;;  %v2133_v11 = vld [vmem:[%s2091_s13 + $0x1e8] sm:$0xff]  ;;  %s1487_s14 = sld [smem:[#allocation2 + $0x5]] }
  0x66   : > { %522 = vmatpush.msra.mxu3 %v2105_v3  ;;  %483 = vmatpush.msra.mxu1 %v2111_v5  ;;  %v2138_v12 = vld [vmem:[%s2091_s13 + $0x60] sm:$0xff]  ;;  %v2154_v16 = vld [vmem:[%s2091_s13 + $0x58] sm:$0xff]  ;;  %v2170_v20 = vld [vmem:[%s2091_s13 + $0x50] sm:$0xff]  ;;  %s1488_s27 = sld [smem:[#allocation2 + $0x2]] }
  0x67   : > { %503 = vmatpush.msra.mxu2 %v2116_v6  ;;  %v2141_v13 = vld [vmem:[%s2091_s13 + $0xe0] sm:$0xff]  ;;  %464 = vmatpush.msra.mxu0 %v2122_v8  ;;  %v2157_v17 = vld [vmem:[%s2091_s13 + $0xd8] sm:$0xff]  ;;  %v2173_v21 = vld [vmem:[%s2091_s13 + $0xd0] sm:$0xff]  ;;  %s1489_s20 = sld [smem:[#allocation2 + $0x6]] }
  0x68   : > { %523 = vmatpush.msra.mxu3 %v2119_v7  ;;  %484 = vmatpush.msra.mxu1 %v2127_v9  ;;  %v2146_v14 = vld [vmem:[%s2091_s13 + $0x160] sm:$0xff]  ;;  %v2162_v18 = vld [vmem:[%s2091_s13 + $0x158] sm:$0xff]  ;;  %v2178_v22 = vld [vmem:[%s2091_s13 + $0x150] sm:$0xff]  ;;  %s1490_s22 = sld [smem:[#allocation2 + $0x3]] }
  0x69   : > { %v2149_v15 = vld [vmem:[%s2091_s13 + $0x1e0] sm:$0xff]  ;;  %504 = vmatpush.msra.mxu2 %v2130_v10  ;;  %465 = vmatpush.msra.mxu0 %v2138_v12  ;;  %v2165_v19 = vld [vmem:[%s2091_s13 + $0x1d8] sm:$0xff]  ;;  %v2181_v23 = vld [vmem:[%s2091_s13 + $0x1d0] sm:$0xff]  ;;  %s647_s2 = ssub.f32 0.0, %s1485_s0 }
  0x6a   : > { %524 = vmatpush.msra.mxu3 %v2133_v11  ;;  %485 = vmatpush.msra.mxu1 %v2141_v13  ;;  %v2186_v24 = vld [vmem:[%s2091_s13 + $0x48] sm:$0xff]  ;;  %v2202_v28 = vld [vmem:[%s2091_s13 + $0x40] sm:$0xff]  ;;  %v2218_v32 = vld [vmem:[%s2091_s13 + $0x38] sm:$0xff]  ;;  %s1491_s23 = sld [smem:[#allocation2 + $0x7]] }
  0x6b   : > { %505 = vmatpush.msra.mxu2 %v2146_v14  ;;  %466 = vmatpush.msra.mxu0 %v2154_v16  ;;  %v2189_v25 = vld [vmem:[%s2091_s13 + $0xc8] sm:$0xff]  ;;  %v2205_v29 = vld [vmem:[%s2091_s13 + $0xc0] sm:$0xff]  ;;  %v2221_v33 = vld [vmem:[%s2091_s13 + $0xb8] sm:$0xff]  ;;  %s861_s21 = ssub.f32 0.0, %s1487_s14 }
  0x6c   : > { %525 = vmatpush.msra.mxu3 %v2149_v15  ;;  %486 = vmatpush.msra.mxu1 %v2157_v17  ;;  %v2194_v26 = vld [vmem:[%s2091_s13 + $0x148] sm:$0xff]  ;;  %v2210_v30 = vld [vmem:[%s2091_s13 + $0x140] sm:$0xff]  ;;  %v2226_v34 = vld [vmem:[%s2091_s13 + $0x138] sm:$0xff] }
  0x6d   : > { %506 = vmatpush.msra.mxu2 %v2162_v18  ;;  %467 = vmatpush.msra.mxu0 %v2170_v20  ;;  %v2197_v27 = vld [vmem:[%s2091_s13 + $0x1c8] sm:$0xff]  ;;  %v2213_v31 = vld [vmem:[%s2091_s13 + $0x1c0] sm:$0xff]  ;;  %v2229_v35 = vld [vmem:[%s2091_s13 + $0x1b8] sm:$0xff]  ;;  %s1075_s7 = ssub.f32 0.0, %s1489_s20 }
  0x6e   : > { %526 = vmatpush.msra.mxu3 %v2165_v19  ;;  %487 = vmatpush.msra.mxu1 %v2173_v21  ;;  %3472 = vst [vmem:[#allocation16_spill] sm:$0xff] %v2229_v35  ;;  %v2234_v36 = vld [vmem:[%s2091_s13 + $0x30] sm:$0xff]  ;;  %v2250_v40 = vld [vmem:[%s2091_s13 + $0x28] sm:$0xff]  ;;  %v2266_v44 = vld [vmem:[%s2091_s13 + $0x20] sm:$0xff] }
  0x6f   : > { %507 = vmatpush.msra.mxu2 %v2178_v22  ;;  %468 = vmatpush.msra.mxu0 %v2186_v24  ;;  %v2237_v37 = vld [vmem:[%s2091_s13 + $0xb0] sm:$0xff]  ;;  %v2253_v41 = vld [vmem:[%s2091_s13 + $0xa8] sm:$0xff]  ;;  %v2269_v45 = vld [vmem:[%s2091_s13 + $0xa0] sm:$0xff] }
  0x70   : > { %527 = vmatpush.msra.mxu3 %v2181_v23  ;;  %488 = vmatpush.msra.mxu1 %v2189_v25  ;;  %v2242_v38 = vld [vmem:[%s2091_s13 + $0x130] sm:$0xff]  ;;  %v2258_v42 = vld [vmem:[%s2091_s13 + $0x128] sm:$0xff]  ;;  %v2274_v46 = vld [vmem:[%s2091_s13 + $0x120] sm:$0xff]  ;;  %s1289_s26 = ssub.f32 0.0, %s1491_s23 }
  0x71   : > { %508 = vmatpush.msra.mxu2 %v2194_v26  ;;  %469 = vmatpush.msra.mxu0 %v2202_v28  ;;  %3473 = vst [vmem:[#allocation17_spill] sm:$0xff] %v2242_v38  ;;  %v2245_v39 = vld [vmem:[%s2091_s13 + $0x1b0] sm:$0xff]  ;;  %v2261_v43 = vld [vmem:[%s2091_s13 + $0x1a8] sm:$0xff]  ;;  %v2277_v47 = vld [vmem:[%s2091_s13 + $0x1a0] sm:$0xff] }
  0x72   : > { %528 = vmatpush.msra.mxu3 %v2197_v27  ;;  %489 = vmatpush.msra.mxu1 %v2205_v29  ;;  %3474 = vst [vmem:[#allocation18_spill] sm:$0xff] %v2245_v39  ;;  %v2282_v48 = vld [vmem:[%s2091_s13 + $0x18] sm:$0xff]  ;;  %v2298_v52 = vld [vmem:[%s2091_s13 + $0x10] sm:$0xff]  ;;  %v2314_v56 = vld [vmem:[%s2091_s13 + $0x8] sm:$0xff] }
  0x73   : > { %509 = vmatpush.msra.mxu2 %v2210_v30  ;;  %470 = vmatpush.msra.mxu0 %v2218_v32  ;;  %3475 = vst [vmem:[#allocation19_spill] sm:$0xff] %v2258_v42  ;;  %v2285_v49 = vld [vmem:[%s2091_s13 + $0x98] sm:$0xff]  ;;  %v2301_v53 = vld [vmem:[%s2091_s13 + $0x90] sm:$0xff]  ;;  %v2317_v57 = vld [vmem:[%s2091_s13 + $0x88] sm:$0xff] }
  0x74   : > { %529 = vmatpush.msra.mxu3 %v2213_v31  ;;  %490 = vmatpush.msra.mxu1 %v2221_v33  ;;  %3476 = vst [vmem:[#allocation20_spill] sm:$0xff] %v2261_v43  ;;  %v2290_v50 = vld [vmem:[%s2091_s13 + $0x118] sm:$0xff]  ;;  %v2306_v54 = vld [vmem:[%s2091_s13 + $0x110] sm:$0xff]  ;;  %v2322_v58 = vld [vmem:[%s2091_s13 + $0x108] sm:$0xff] }
  0x75   : > { %510 = vmatpush.msra.mxu2 %v2226_v34  ;;  %471 = vmatpush.msra.mxu0 %v2234_v36  ;;  %3477 = vst [vmem:[#allocation21_spill] sm:$0xff] %v2274_v46  ;;  %v2293_v51 = vld [vmem:[%s2091_s13 + $0x198] sm:$0xff]  ;;  %v2309_v55 = vld [vmem:[%s2091_s13 + $0x190] sm:$0xff]  ;;  %v2325_v59 = vld [vmem:[%s2091_s13 + $0x188] sm:$0xff] }
  0x76   : > { %530 = vmatpush.msra.mxu3 %v2229_v35  ;;  %491 = vmatpush.msra.mxu1 %v2237_v37  ;;  %3478 = vst [vmem:[#allocation22_spill] sm:$0xff] %v2277_v47  ;;  %v2330_v60 = vld [vmem:[%s2091_s13] sm:$0xff] }
  0x77   : > { %511 = vmatpush.msra.mxu2 %v2242_v38  ;;  %472 = vmatpush.msra.mxu0 %v2250_v40  ;;  %3479 = vst [vmem:[#allocation23_spill] sm:$0xff] %v2282_v48  ;;  %v2333_v61 = vld [vmem:[%s2091_s13 + $0x80] sm:$0xff] }
  0x78   : > { %531 = vmatpush.msra.mxu3 %v2245_v39  ;;  %492 = vmatpush.msra.mxu1 %v2253_v41  ;;  %3480 = vst [vmem:[#allocation24_spill] sm:$0xff] %v2285_v49  ;;  %v2338_v62 = vld [vmem:[%s2091_s13 + $0x100] sm:$0xff] }
  0x79   : > { %512 = vmatpush.msra.mxu2 %v2258_v42  ;;  %473 = vmatpush.msra.mxu0 %v2266_v44  ;;  %3481 = vst [vmem:[#allocation25_spill] sm:$0xff] %v2290_v50  ;;  %v2341_v63 = vld [vmem:[%s2091_s13 + $0x180] sm:$0xff] }
  0x7a   : > { %532 = vmatpush.msra.mxu3 %v2261_v43  ;;  %493 = vmatpush.msra.mxu1 %v2269_v45  ;;  %3482 = vst [vmem:[#allocation26_spill] sm:$0xff] %v2293_v51 }
  0x7b   : > { %513 = vmatpush.msra.mxu2 %v2274_v46  ;;  %3483 = vst [vmem:[#allocation27_spill] sm:$0xff] %v2298_v52  ;;  %474 = vmatpush.msra.mxu0 %v2282_v48 }
  0x7c   : > { %533 = vmatpush.msra.mxu3 %v2277_v47  ;;  %3484 = vst [vmem:[#allocation28_spill] sm:$0xff] %v2301_v53  ;;  %494 = vmatpush.msra.mxu1 %v2285_v49 }
  0x7d   : > { %3485 = vst [vmem:[#allocation29_spill] sm:$0xff] %v2306_v54  ;;  %514 = vmatpush.msra.mxu2 %v2290_v50  ;;  %475 = vmatpush.msra.mxu0 %v2298_v52 }
  0x7e   : > { %3486 = vst [vmem:[#allocation30_spill] sm:$0xff] %v2309_v55  ;;  %534 = vmatpush.msra.mxu3 %v2293_v51  ;;  %495 = vmatpush.msra.mxu1 %v2301_v53  ;;  %v2618_v53 = vld [vmem:[%s2076_s8 + $0x4] sm:$0x1] }
  0x7f   : > { %3487 = vst [vmem:[#allocation31_spill] sm:$0xff] %v2314_v56  ;;  %515 = vmatpush.msra.mxu2 %v2306_v54  ;;  %476 = vmatpush.msra.mxu0 %v2314_v56  ;;  %v2349_v54 = vld [vmem:[%s2076_s8 + $0x1] sm:$0x1]  ;;  %v2357_v56 = vld [vmem:[%s2076_s8 + $0x3] sm:$0x1] }
  0x80   : > { %3488 = vst [vmem:[#allocation32_spill] sm:$0xff] %v2317_v57  ;;  %535 = vmatpush.msra.mxu3 %v2309_v55  ;;  %496 = vmatpush.msra.mxu1 %v2317_v57  ;;  %v2346_v55 = vld [vmem:[%s2076_s8] sm:$0x1]  ;;  %v2354_v57 = vld [vmem:[%s2076_s8 + $0x2] sm:$0x1] }
  0x81   : > { %3489 = vst [vmem:[#allocation33_spill] sm:$0xff] %v2322_v58  ;;  %516 = vmatpush.msra.mxu2 %v2322_v58  ;;  %477 = vmatpush.msra.mxu0 %v2330_v60  ;;  %v2365_v58 = vld [vmem:[%s2091_s13 + $0x2f8] sm:$0xff] }
  0x82   : > { %3490 = vst [vmem:[#allocation34_spill] sm:$0xff] %v2325_v59  ;;  %536 = vmatpush.msra.mxu3 %v2325_v59  ;;  %497 = vmatpush.msra.mxu1 %v2333_v61  ;;  %v2362_v59 = vld [vmem:[%s2091_s13 + $0x278] sm:$0xff] }
  0x83   : > { %3491 = vst [vmem:[#allocation35_spill] sm:$0xff] %v2330_v60  ;;  %517 = vmatpush.msra.mxu2 %v2338_v62  ;;  %478 = vmatmul.f32.vlgmr.msra.gmra.mxu0 %v2346_v55  ;;  %v2373_v60 = vld [vmem:[%s2091_s13 + $0x3f8] sm:$0xff] }
  0x84   : > { %3492 = vst [vmem:[#allocation36_spill] sm:$0xff] %v2333_v61  ;;  %537 = vmatpush.msra.mxu3 %v2341_v63  ;;  %498 = vmatmul.f32.vlgmr.msra.gmra.mxu1 %v2349_v54  ;;  %v2370_v61 = vld [vmem:[%s2091_s13 + $0x378] sm:$0xff] }
  0x85   : > { %3493 = vst [vmem:[#allocation37_spill] sm:$0xff] %v2338_v62  ;;  %518 = vmatmul.f32.vlgmr.msra.gmra.mxu2 %v2354_v57  ;;  %538 = vmatmul.f32.vlgmr.msra.gmra.mxu3 %v2357_v56  ;;  %v2381_v62 = vld [vmem:[%s2091_s13 + $0x2f0] sm:$0xff] }
  0x86   : > { %3494 = vst [vmem:[#allocation38_spill] sm:$0xff] %v2341_v63  ;;  %v2378_v63 = vld [vmem:[%s2091_s13 + $0x270] sm:$0xff]  ;;  %542 = vmatpush.msrb.mxu0 %v2362_v59  ;;  %562 = vmatpush.msrb.mxu1 %v2365_v58 }
  0x87   : > { %3495 = vst [vmem:[#allocation39_spill] sm:$0xff] %v2346_v55  ;;  %v2389_v55 = vld [vmem:[%s2091_s13 + $0x3f0] sm:$0xff]  ;;  %582 = vmatpush.msrb.mxu2 %v2370_v61  ;;  %602 = vmatpush.msrb.mxu3 %v2373_v60 }
  0x88   : > { %3496 = vst [vmem:[#allocation40_spill] sm:$0xff] %v2349_v54  ;;  %v2386_v54 = vld [vmem:[%s2091_s13 + $0x370] sm:$0xff]  ;;  %543 = vmatpush.msrb.mxu0 %v2378_v63  ;;  %563 = vmatpush.msrb.mxu1 %v2381_v62 }
  0x89   : > { %3497 = vst [vmem:[#allocation41_spill] sm:$0xff] %v2354_v57  ;;  %v2397_v57 = vld [vmem:[%s2091_s13 + $0x2e8] sm:$0xff]  ;;  %583 = vmatpush.msrb.mxu2 %v2386_v54  ;;  %603 = vmatpush.msrb.mxu3 %v2389_v55 }
  0x8a   : > { %3498 = vst [vmem:[#allocation42_spill] sm:$0xff] %v2357_v56  ;;  %v2394_v56 = vld [vmem:[%s2091_s13 + $0x268] sm:$0xff]  ;;  %564 = vmatpush.msrb.mxu1 %v2397_v57 }
  0x8b   : > { %3499 = vst [vmem:[#allocation43_spill] sm:$0xff] %v2362_v59  ;;  %v2405_v59 = vld [vmem:[%s2091_s13 + $0x3e8] sm:$0xff]  ;;  %544 = vmatpush.msrb.mxu0 %v2394_v56 }
  0x8c   : > { %3500 = vst [vmem:[#allocation44_spill] sm:$0xff] %v2365_v58  ;;  %v2402_v58 = vld [vmem:[%s2091_s13 + $0x368] sm:$0xff]  ;;  %604 = vmatpush.msrb.mxu3 %v2405_v59 }
  0x8d   : > { %3501 = vst [vmem:[#allocation45_spill] sm:$0xff] %v2370_v61  ;;  %v2413_v61 = vld [vmem:[%s2091_s13 + $0x2e0] sm:$0xff]  ;;  %584 = vmatpush.msrb.mxu2 %v2402_v58 }
  0x8e   : > { %3502 = vst [vmem:[#allocation46_spill] sm:$0xff] %v2373_v60  ;;  %v2410_v60 = vld [vmem:[%s2091_s13 + $0x260] sm:$0xff]  ;;  %565 = vmatpush.msrb.mxu1 %v2413_v61 }
  0x8f   : > { %3503 = vst [vmem:[#allocation47_spill] sm:$0xff] %v2378_v63  ;;  %v2421_v63 = vld [vmem:[%s2091_s13 + $0x3e0] sm:$0xff]  ;;  %545 = vmatpush.msrb.mxu0 %v2410_v60 }
  0x90   : > { %3504 = vst [vmem:[#allocation48_spill] sm:$0xff] %v2381_v62  ;;  %v2418_v62 = vld [vmem:[%s2091_s13 + $0x360] sm:$0xff]  ;;  %605 = vmatpush.msrb.mxu3 %v2421_v63 }
  0x91   : > { %3505 = vst [vmem:[#allocation49_spill] sm:$0xff] %v2386_v54  ;;  %v2429_v54 = vld [vmem:[%s2091_s13 + $0x2d8] sm:$0xff]  ;;  %585 = vmatpush.msrb.mxu2 %v2418_v62 }
  0x92   : > { %3506 = vst [vmem:[#allocation50_spill] sm:$0xff] %v2389_v55  ;;  %v2426_v55 = vld [vmem:[%s2091_s13 + $0x258] sm:$0xff]  ;;  %566 = vmatpush.msrb.mxu1 %v2429_v54 }
  0x93   : > { %3507 = vst [vmem:[#allocation51_spill] sm:$0xff] %v2394_v56  ;;  %v2437_v56 = vld [vmem:[%s2091_s13 + $0x3d8] sm:$0xff]  ;;  %546 = vmatpush.msrb.mxu0 %v2426_v55 }
  0x94   : > { %3508 = vst [vmem:[#allocation52_spill] sm:$0xff] %v2397_v57  ;;  %v2434_v57 = vld [vmem:[%s2091_s13 + $0x358] sm:$0xff]  ;;  %606 = vmatpush.msrb.mxu3 %v2437_v56 }
  0x95   : > { %3509 = vst [vmem:[#allocation53_spill] sm:$0xff] %v2402_v58  ;;  %v2445_v58 = vld [vmem:[%s2091_s13 + $0x2d0] sm:$0xff]  ;;  %586 = vmatpush.msrb.mxu2 %v2434_v57 }
  0x96   : > { %3510 = vst [vmem:[#allocation54_spill] sm:$0xff] %v2405_v59  ;;  %v2442_v59 = vld [vmem:[%s2091_s13 + $0x250] sm:$0xff]  ;;  %567 = vmatpush.msrb.mxu1 %v2445_v58 }
  0x97   : > { %3511 = vst [vmem:[#allocation55_spill] sm:$0xff] %v2410_v60  ;;  %v2453_v60 = vld [vmem:[%s2091_s13 + $0x3d0] sm:$0xff]  ;;  %547 = vmatpush.msrb.mxu0 %v2442_v59 }
  0x98   : > { %3512 = vst [vmem:[#allocation56_spill] sm:$0xff] %v2413_v61  ;;  %v2450_v61 = vld [vmem:[%s2091_s13 + $0x350] sm:$0xff]  ;;  %607 = vmatpush.msrb.mxu3 %v2453_v60 }
  0x99   : > { %3513 = vst [vmem:[#allocation57_spill] sm:$0xff] %v2418_v62  ;;  %v2461_v62 = vld [vmem:[%s2091_s13 + $0x2c8] sm:$0xff]  ;;  %587 = vmatpush.msrb.mxu2 %v2450_v61 }
  0x9a   : > { %3514 = vst [vmem:[#allocation58_spill] sm:$0xff] %v2421_v63  ;;  %v2458_v63 = vld [vmem:[%s2091_s13 + $0x248] sm:$0xff]  ;;  %568 = vmatpush.msrb.mxu1 %v2461_v62 }
  0x9b   : > { %3515 = vst [vmem:[#allocation59_spill] sm:$0xff] %v2426_v55  ;;  %v2469_v55 = vld [vmem:[%s2091_s13 + $0x3c8] sm:$0xff]  ;;  %548 = vmatpush.msrb.mxu0 %v2458_v63 }
  0x9c   : > { %3516 = vst [vmem:[#allocation60_spill] sm:$0xff] %v2429_v54  ;;  %v2466_v54 = vld [vmem:[%s2091_s13 + $0x348] sm:$0xff]  ;;  %608 = vmatpush.msrb.mxu3 %v2469_v55 }
  0x9d   : > { %3517 = vst [vmem:[#allocation61_spill] sm:$0xff] %v2434_v57  ;;  %v2477_v57 = vld [vmem:[%s2091_s13 + $0x2c0] sm:$0xff]  ;;  %588 = vmatpush.msrb.mxu2 %v2466_v54 }
  0x9e   : > { %3518 = vst [vmem:[#allocation62_spill] sm:$0xff] %v2437_v56  ;;  %v2474_v56 = vld [vmem:[%s2091_s13 + $0x240] sm:$0xff]  ;;  %569 = vmatpush.msrb.mxu1 %v2477_v57 }
  0x9f   : > { %3519 = vst [vmem:[#allocation63_spill] sm:$0xff] %v2442_v59  ;;  %v2485_v59 = vld [vmem:[%s2091_s13 + $0x3c0] sm:$0xff]  ;;  %549 = vmatpush.msrb.mxu0 %v2474_v56 }
  0xa0   : > { %3520 = vst [vmem:[#allocation64_spill] sm:$0xff] %v2445_v58  ;;  %v2482_v58 = vld [vmem:[%s2091_s13 + $0x340] sm:$0xff]  ;;  %609 = vmatpush.msrb.mxu3 %v2485_v59 }
  0xa1   : > { %3521 = vst [vmem:[#allocation65_spill] sm:$0xff] %v2450_v61  ;;  %v2493_v61 = vld [vmem:[%s2091_s13 + $0x2b8] sm:$0xff]  ;;  %589 = vmatpush.msrb.mxu2 %v2482_v58 }
  0xa2   : > { %3522 = vst [vmem:[#allocation66_spill] sm:$0xff] %v2453_v60  ;;  %v2490_v60 = vld [vmem:[%s2091_s13 + $0x238] sm:$0xff]  ;;  %570 = vmatpush.msrb.mxu1 %v2493_v61 }
  0xa3   : > { %3523 = vst [vmem:[#allocation67_spill] sm:$0xff] %v2458_v63  ;;  %v2501_v63 = vld [vmem:[%s2091_s13 + $0x3b8] sm:$0xff]  ;;  %550 = vmatpush.msrb.mxu0 %v2490_v60 }
  0xa4   : > { %3524 = vst [vmem:[#allocation68_spill] sm:$0xff] %v2461_v62  ;;  %v2498_v62 = vld [vmem:[%s2091_s13 + $0x338] sm:$0xff]  ;;  %610 = vmatpush.msrb.mxu3 %v2501_v63 }
  0xa5   : > { %3525 = vst [vmem:[#allocation69_spill] sm:$0xff] %v2466_v54  ;;  %v2509_v54 = vld [vmem:[%s2091_s13 + $0x2b0] sm:$0xff]  ;;  %590 = vmatpush.msrb.mxu2 %v2498_v62 }
  0xa6   : > { %3526 = vst [vmem:[#allocation70_spill] sm:$0xff] %v2469_v55  ;;  %v2506_v55 = vld [vmem:[%s2091_s13 + $0x230] sm:$0xff]  ;;  %571 = vmatpush.msrb.mxu1 %v2509_v54 }
  0xa7   : > { %3527 = vst [vmem:[#allocation71_spill] sm:$0xff] %v2474_v56  ;;  %v2517_v56 = vld [vmem:[%s2091_s13 + $0x3b0] sm:$0xff]  ;;  %551 = vmatpush.msrb.mxu0 %v2506_v55 }
  0xa8   : > { %3528 = vst [vmem:[#allocation72_spill] sm:$0xff] %v2477_v57  ;;  %v2514_v57 = vld [vmem:[%s2091_s13 + $0x330] sm:$0xff]  ;;  %611 = vmatpush.msrb.mxu3 %v2517_v56 }
  0xa9   : > { %3529 = vst [vmem:[#allocation73_spill] sm:$0xff] %v2482_v58  ;;  %v2525_v58 = vld [vmem:[%s2091_s13 + $0x2a8] sm:$0xff]  ;;  %591 = vmatpush.msrb.mxu2 %v2514_v57 }
  0xaa   : > { %3530 = vst [vmem:[#allocation74_spill] sm:$0xff] %v2485_v59  ;;  %v2522_v59 = vld [vmem:[%s2091_s13 + $0x228] sm:$0xff]  ;;  %572 = vmatpush.msrb.mxu1 %v2525_v58 }
  0xab   : > { %3531 = vst [vmem:[#allocation75_spill] sm:$0xff] %v2490_v60  ;;  %v2533_v60 = vld [vmem:[%s2091_s13 + $0x3a8] sm:$0xff]  ;;  %552 = vmatpush.msrb.mxu0 %v2522_v59 }
  0xac   : > { %3532 = vst [vmem:[#allocation76_spill] sm:$0xff] %v2493_v61  ;;  %v2530_v61 = vld [vmem:[%s2091_s13 + $0x328] sm:$0xff]  ;;  %612 = vmatpush.msrb.mxu3 %v2533_v60 }
  0xad   : > { %3533 = vst [vmem:[#allocation77_spill] sm:$0xff] %v2498_v62  ;;  %v2541_v62 = vld [vmem:[%s2091_s13 + $0x2a0] sm:$0xff]  ;;  %592 = vmatpush.msrb.mxu2 %v2530_v61 }
  0xae   : > { %3534 = vst [vmem:[#allocation78_spill] sm:$0xff] %v2501_v63  ;;  %v2538_v63 = vld [vmem:[%s2091_s13 + $0x220] sm:$0xff]  ;;  %573 = vmatpush.msrb.mxu1 %v2541_v62 }
  0xaf   : > { %3535 = vst [vmem:[#allocation79_spill] sm:$0xff] %v2506_v55  ;;  %v2549_v55 = vld [vmem:[%s2091_s13 + $0x3a0] sm:$0xff]  ;;  %553 = vmatpush.msrb.mxu0 %v2538_v63 }
  0xb0   : > { %3536 = vst [vmem:[#allocation80_spill] sm:$0xff] %v2509_v54  ;;  %v2546_v54 = vld [vmem:[%s2091_s13 + $0x320] sm:$0xff]  ;;  %613 = vmatpush.msrb.mxu3 %v2549_v55 }
  0xb1   : > { %3537 = vst [vmem:[#allocation81_spill] sm:$0xff] %v2514_v57  ;;  %v2557_v57 = vld [vmem:[%s2091_s13 + $0x298] sm:$0xff]  ;;  %593 = vmatpush.msrb.mxu2 %v2546_v54 }
  0xb2   : > { %3538 = vst [vmem:[#allocation82_spill] sm:$0xff] %v2517_v56  ;;  %v2554_v56 = vld [vmem:[%s2091_s13 + $0x218] sm:$0xff]  ;;  %574 = vmatpush.msrb.mxu1 %v2557_v57 }
  0xb3   : > { %3539 = vst [vmem:[#allocation83_spill] sm:$0xff] %v2522_v59  ;;  %v2565_v59 = vld [vmem:[%s2091_s13 + $0x398] sm:$0xff]  ;;  %554 = vmatpush.msrb.mxu0 %v2554_v56 }
  0xb4   : > { %3540 = vst [vmem:[#allocation84_spill] sm:$0xff] %v2525_v58  ;;  %v2562_v58 = vld [vmem:[%s2091_s13 + $0x318] sm:$0xff]  ;;  %614 = vmatpush.msrb.mxu3 %v2565_v59 }
  0xb5   : > { %3541 = vst [vmem:[#allocation85_spill] sm:$0xff] %v2530_v61  ;;  %v2573_v61 = vld [vmem:[%s2091_s13 + $0x290] sm:$0xff]  ;;  %594 = vmatpush.msrb.mxu2 %v2562_v58 }
  0xb6   : > { %3542 = vst [vmem:[#allocation86_spill] sm:$0xff] %v2533_v60  ;;  %v2570_v60 = vld [vmem:[%s2091_s13 + $0x210] sm:$0xff]  ;;  %575 = vmatpush.msrb.mxu1 %v2573_v61 }
  0xb7   : > { %3543 = vst [vmem:[#allocation87_spill] sm:$0xff] %v2538_v63  ;;  %v2581_v63 = vld [vmem:[%s2091_s13 + $0x390] sm:$0xff]  ;;  %555 = vmatpush.msrb.mxu0 %v2570_v60 }
  0xb8   : > { %3544 = vst [vmem:[#allocation88_spill] sm:$0xff] %v2541_v62  ;;  %v2578_v62 = vld [vmem:[%s2091_s13 + $0x310] sm:$0xff]  ;;  %615 = vmatpush.msrb.mxu3 %v2581_v63 }
  0xb9   : > { %3545 = vst [vmem:[#allocation89_spill] sm:$0xff] %v2546_v54  ;;  %v2589_v54 = vld [vmem:[%s2091_s13 + $0x288] sm:$0xff]  ;;  %595 = vmatpush.msrb.mxu2 %v2578_v62 }
  0xba   : > { %3546 = vst [vmem:[#allocation90_spill] sm:$0xff] %v2549_v55  ;;  %v2586_v55 = vld [vmem:[%s2091_s13 + $0x208] sm:$0xff]  ;;  %576 = vmatpush.msrb.mxu1 %v2589_v54 }
  0xbb   : > { %3547 = vst [vmem:[#allocation91_spill] sm:$0xff] %v2554_v56  ;;  %v2597_v56 = vld [vmem:[%s2091_s13 + $0x388] sm:$0xff]  ;;  %556 = vmatpush.msrb.mxu0 %v2586_v55 }
  0xbc   : > { %3548 = vst [vmem:[#allocation92_spill] sm:$0xff] %v2557_v57  ;;  %v2594_v57 = vld [vmem:[%s2091_s13 + $0x308] sm:$0xff]  ;;  %616 = vmatpush.msrb.mxu3 %v2597_v56 }
  0xbd   : > { %3549 = vst [vmem:[#allocation93_spill] sm:$0xff] %v2562_v58  ;;  %v2605_v58 = vld [vmem:[%s2091_s13 + $0x280] sm:$0xff]  ;;  %596 = vmatpush.msrb.mxu2 %v2594_v57 }
  0xbe   : > { %3550 = vst [vmem:[#allocation94_spill] sm:$0xff] %v2565_v59  ;;  %v2602_v59 = vld [vmem:[%s2091_s13 + $0x200] sm:$0xff]  ;;  %577 = vmatpush.msrb.mxu1 %v2605_v58 }
  0xbf   : > { %3551 = vst [vmem:[#allocation95_spill] sm:$0xff] %v2570_v60  ;;  %v2610_v60 = vld [vmem:[%s2091_s13 + $0x300] sm:$0xff]  ;;  %557 = vmatpush.msrb.mxu0 %v2602_v59 }
  0xc0   : > { %3552 = vst [vmem:[#allocation96_spill] sm:$0xff] %v2573_v61  ;;  %v2613_v61 = vld [vmem:[%s2091_s13 + $0x380] sm:$0xff]  ;;  %597 = vmatpush.msrb.mxu2 %v2610_v60  ;;  %558 = vmatmul.f32.vlgmr.msrb.gmra.mxu0 %v2618_v53 }
  0xc1   : > { %3553 = vst [vmem:[#allocation97_spill] sm:$0xff] %v2578_v62  ;;  %v2621_v62 = vld [vmem:[%s2076_s8 + $0x5] sm:$0x1]  ;;  %617 = vmatpush.msrb.mxu3 %v2613_v61  ;;  %676 = vmatpush.msra.mxu0 %v2094_v0 }
  0xc2   : > { %3554 = vst [vmem:[#allocation98_spill] sm:$0xff] %v2581_v63  ;;  %v2626_v63 = vld [vmem:[%s2076_s8 + $0x6] sm:$0x1]  ;;  %578 = vmatmul.f32.vlgmr.msrb.gmra.mxu1 %v2621_v62  ;;  %716 = vmatpush.msra.mxu2 %v2100_v2 }
  0xc3   : > { %3555 = vst [vmem:[#allocation99_spill] sm:$0xff] %v2586_v55  ;;  %v2629_v55 = vld [vmem:[%s2076_s8 + $0x7] sm:$0x1]  ;;  %598 = vmatmul.f32.vlgmr.msrb.gmra.mxu2 %v2626_v63  ;;  %696 = vmatpush.msra.mxu1 %v2097_v1  ;;  %s3230_s8 = scalar_lea.vmem [#allocation10], %s2072_s29  ;;  %s1493_s29 = sshll.u32 %s1986_s28, 3 }
  0xc4   : > { %3556 = vst [vmem:[#allocation100_spill] sm:$0xff] %v2589_v54  ;;  %618 = vmatmul.f32.vlgmr.msrb.gmra.mxu3 %v2629_v55  ;;  %677 = vmatpush.msra.mxu0 %v2108_v4  ;;  %s1336_s12 = sshll.u32 %s3230_s8, 4  ;;  %s1325_s28 = scalar_lea.sflag [#allocation4], %s2069_s10  ;;  %s1337_s12 = int_to_ptr.vmem [resolvable:$true] %s1336_s12 }
  0xc5   : > { %3557 = vst [vmem:[#allocation101_spill] sm:$0xff] %v2594_v57  ;;  %736 = vmatpush.msra.mxu3 %v2105_v3  ;;  %697 = vmatpush.msra.mxu1 %v2111_v5 }
  0xc6   : > { %3558 = vst [vmem:[#allocation102_spill] sm:$0xff] %v2597_v56  ;;  %717 = vmatpush.msra.mxu2 %v2116_v6  ;;  %678 = vmatpush.msra.mxu0 %v2122_v8 }
  0xc7   : > { %3559 = vst [vmem:[#allocation103_spill] sm:$0xff] %v2602_v59  ;;  %737 = vmatpush.msra.mxu3 %v2119_v7  ;;  %698 = vmatpush.msra.mxu1 %v2127_v9 }
  0xc8   : > { %3560 = vst [vmem:[#allocation104_spill] sm:$0xff] %v2605_v58  ;;  %718 = vmatpush.msra.mxu2 %v2130_v10  ;;  %679 = vmatpush.msra.mxu0 %v2138_v12 }
  0xc9   : > { %3561 = vst [vmem:[#allocation105_spill] sm:$0xff] %v2610_v60  ;;  %738 = vmatpush.msra.mxu3 %v2133_v11  ;;  %699 = vmatpush.msra.mxu1 %v2141_v13 }
  0xca   : > { %3562 = vst [vmem:[#allocation106_spill] sm:$0xff] %v2613_v61  ;;  %719 = vmatpush.msra.mxu2 %v2146_v14  ;;  %680 = vmatpush.msra.mxu0 %v2154_v16 }
  0xcb   : > { %3563 = vst [vmem:[#allocation107_spill] sm:$0xff] %v2618_v53  ;;  %739 = vmatpush.msra.mxu3 %v2149_v15  ;;  %700 = vmatpush.msra.mxu1 %v2157_v17  ;;  %v3640_v53 = vld [vmem:[#allocation42_spill] sm:$0xff] }
  0xcc   : > { %3564 = vst [vmem:[#allocation108_spill] sm:$0xff] %v2621_v62  ;;  %720 = vmatpush.msra.mxu2 %v2162_v18  ;;  %681 = vmatpush.msra.mxu0 %v2170_v20 }
  0xcd   : > { %3565 = vst [vmem:[#allocation109_spill] sm:$0xff] %v2626_v63  ;;  %740 = vmatpush.msra.mxu3 %v2165_v19  ;;  %701 = vmatpush.msra.mxu1 %v2173_v21  ;;  %v3568_v63 = vld [vmem:[#allocation29_spill] sm:$0xff] }
  0xce   : > { %3566 = vst [vmem:[#allocation110_spill] sm:$0xff] %v2629_v55  ;;  %721 = vmatpush.msra.mxu2 %v2178_v22  ;;  %682 = vmatpush.msra.mxu0 %v2186_v24  ;;  %v3567_v55 = vld [vmem:[#allocation28_spill] sm:$0xff] }
  0xcf   : > { %741 = vmatpush.msra.mxu3 %v2181_v23  ;;  %702 = vmatpush.msra.mxu1 %v2189_v25 }
  0xd0   : > { %722 = vmatpush.msra.mxu2 %v2194_v26  ;;  %683 = vmatpush.msra.mxu0 %v2202_v28 }
  0xd1   : > { %742 = vmatpush.msra.mxu3 %v2197_v27  ;;  %703 = vmatpush.msra.mxu1 %v2205_v29 }
  0xd2   : > { %723 = vmatpush.msra.mxu2 %v2210_v30  ;;  %684 = vmatpush.msra.mxu0 %v2218_v32 }
  0xd3   : > { %743 = vmatpush.msra.mxu3 %v2213_v31  ;;  %704 = vmatpush.msra.mxu1 %v2221_v33 }
  0xd4   : > { %724 = vmatpush.msra.mxu2 %v2226_v34  ;;  %685 = vmatpush.msra.mxu0 %v2234_v36 }
  0xd5   : > { %744 = vmatpush.msra.mxu3 %v2229_v35  ;;  %705 = vmatpush.msra.mxu1 %v2237_v37 }
  0xd6   : > { %725 = vmatpush.msra.mxu2 %v2242_v38  ;;  %686 = vmatpush.msra.mxu0 %v2250_v40  ;;  %v3574_v38 = vld [vmem:[#allocation35_spill] sm:$0xff] }
  0xd7   : > { %745 = vmatpush.msra.mxu3 %v2245_v39  ;;  %706 = vmatpush.msra.mxu1 %v2253_v41  ;;  %v3573_v39 = vld [vmem:[#allocation34_spill] sm:$0xff] }
  0xd8   : > { %726 = vmatpush.msra.mxu2 %v2258_v42  ;;  %687 = vmatpush.msra.mxu0 %v2266_v44  ;;  %v3570_v42 = vld [vmem:[#allocation31_spill] sm:$0xff] }
  0xd9   : > { %746 = vmatpush.msra.mxu3 %v2261_v43  ;;  %707 = vmatpush.msra.mxu1 %v2269_v45  ;;  %v3569_v43 = vld [vmem:[#allocation30_spill] sm:$0xff] }
  0xda   : > { %727 = vmatpush.msra.mxu2 %v2274_v46  ;;  %688 = vmatpush.msra.mxu0 %v2282_v48  ;;  %v3571_v46 = vld [vmem:[#allocation32_spill] sm:$0xff]  ;;  %v3639_v48 = vld [vmem:[#allocation41_spill] sm:$0xff] }
  0xdb   : > { %747 = vmatpush.msra.mxu3 %v2277_v47  ;;  %708 = vmatpush.msra.mxu1 %v2285_v49  ;;  %v3572_v47 = vld [vmem:[#allocation33_spill] sm:$0xff] }
  0xdc   : > { %728 = vmatpush.msra.mxu2 %v2290_v50  ;;  %689 = vmatpush.msra.mxu0 %v2298_v52  ;;  %v3575_v50 = vld [vmem:[#allocation36_spill] sm:$0xff] }
  0xdd   : > { %748 = vmatpush.msra.mxu3 %v2293_v51  ;;  %709 = vmatpush.msra.mxu1 %v3567_v55  ;;  %v3576_v51 = vld [vmem:[#allocation43_spill] sm:$0xff]  ;;  %v3577_v52 = vld [vmem:[#allocation44_spill] sm:$0xff]  ;;  %v3578_v55 = vld [vmem:[#allocation37_spill] sm:$0xff] }
  0xde   : > { %729 = vmatpush.msra.mxu2 %v3568_v63  ;;  %690 = vmatpush.msra.mxu0 %v3570_v42  ;;  %v3579_v63 = vld [vmem:[#allocation38_spill] sm:$0xff]  ;;  %v3581_v42 = vld [vmem:[#allocation48_spill] sm:$0xff] }
  0xdf   : > { %749 = vmatpush.msra.mxu3 %v3569_v43  ;;  %710 = vmatpush.msra.mxu1 %v3571_v46  ;;  %v3580_v43 = vld [vmem:[#allocation47_spill] sm:$0xff]  ;;  %v3582_v46 = vld [vmem:[#allocation45_spill] sm:$0xff] }
  0xe0   : > { %730 = vmatpush.msra.mxu2 %v3572_v47  ;;  %691 = vmatpush.msra.mxu0 %v3574_v38  ;;  %v3583_v47 = vld [vmem:[#allocation46_spill] sm:$0xff]  ;;  %v3585_v38 = vld [vmem:[#allocation52_spill] sm:$0xff] }
  0xe1   : > { %750 = vmatpush.msra.mxu3 %v3573_v39  ;;  %711 = vmatpush.msra.mxu1 %v3575_v50  ;;  %v3584_v39 = vld [vmem:[#allocation51_spill] sm:$0xff]  ;;  %v3586_v50 = vld [vmem:[#allocation49_spill] sm:$0xff] }
  0xe2   : > { %756 = vmatpush.msrb.mxu0 %v3576_v51  ;;  %731 = vmatpush.msra.mxu2 %v3578_v55  ;;  %v3587_v51 = vld [vmem:[#allocation50_spill] sm:$0xff]  ;;  %v3589_v55 = vld [vmem:[#allocation56_spill] sm:$0xff] }
  0xe3   : > { %776 = vmatpush.msrb.mxu1 %v3577_v52  ;;  %751 = vmatpush.msra.mxu3 %v3579_v63  ;;  %v3588_v52 = vld [vmem:[#allocation55_spill] sm:$0xff]  ;;  %v3590_v63 = vld [vmem:[#allocation53_spill] sm:$0xff] }
  0xe4   : > { %757 = vmatpush.msrb.mxu0 %v3580_v43  ;;  %796 = vmatpush.msrb.mxu2 %v3582_v46  ;;  %v3591_v43 = vld [vmem:[#allocation54_spill] sm:$0xff]  ;;  %v3593_v46 = vld [vmem:[#allocation60_spill] sm:$0xff] }
  0xe5   : > { %777 = vmatpush.msrb.mxu1 %v3581_v42  ;;  %816 = vmatpush.msrb.mxu3 %v3583_v47  ;;  %v3592_v42 = vld [vmem:[#allocation59_spill] sm:$0xff]  ;;  %v3594_v47 = vld [vmem:[#allocation57_spill] sm:$0xff] }
  0xe6   : > { %758 = vmatpush.msrb.mxu0 %v3584_v39  ;;  %797 = vmatpush.msrb.mxu2 %v3586_v50  ;;  %v3595_v39 = vld [vmem:[#allocation58_spill] sm:$0xff]  ;;  %v3597_v50 = vld [vmem:[#allocation64_spill] sm:$0xff] }
  0xe7   : > { %778 = vmatpush.msrb.mxu1 %v3585_v38  ;;  %817 = vmatpush.msrb.mxu3 %v3587_v51  ;;  %v3596_v38 = vld [vmem:[#allocation63_spill] sm:$0xff]  ;;  %v3598_v51 = vld [vmem:[#allocation61_spill] sm:$0xff] }
  0xe8   : > { %759 = vmatpush.msrb.mxu0 %v3588_v52  ;;  %798 = vmatpush.msrb.mxu2 %v3590_v63  ;;  %v3599_v52 = vld [vmem:[#allocation62_spill] sm:$0xff]  ;;  %v3601_v63 = vld [vmem:[#allocation68_spill] sm:$0xff] }
  0xe9   : > { %779 = vmatpush.msrb.mxu1 %v3589_v55  ;;  %818 = vmatpush.msrb.mxu3 %v3591_v43  ;;  %v3600_v55 = vld [vmem:[#allocation67_spill] sm:$0xff]  ;;  %v3602_v43 = vld [vmem:[#allocation65_spill] sm:$0xff] }
  0xea   : > { %760 = vmatpush.msrb.mxu0 %v3592_v42  ;;  %799 = vmatpush.msrb.mxu2 %v3594_v47  ;;  %v3603_v42 = vld [vmem:[#allocation66_spill] sm:$0xff]  ;;  %v3605_v47 = vld [vmem:[#allocation72_spill] sm:$0xff] }
  0xeb   : > { %780 = vmatpush.msrb.mxu1 %v3593_v46  ;;  %819 = vmatpush.msrb.mxu3 %v3595_v39  ;;  %v3604_v46 = vld [vmem:[#allocation71_spill] sm:$0xff]  ;;  %v3606_v39 = vld [vmem:[#allocation69_spill] sm:$0xff] }
  0xec   : > { %761 = vmatpush.msrb.mxu0 %v3596_v38  ;;  %800 = vmatpush.msrb.mxu2 %v3598_v51  ;;  %v3607_v38 = vld [vmem:[#allocation70_spill] sm:$0xff]  ;;  %v3609_v51 = vld [vmem:[#allocation76_spill] sm:$0xff] }
  0xed   : > { %781 = vmatpush.msrb.mxu1 %v3597_v50  ;;  %820 = vmatpush.msrb.mxu3 %v3599_v52  ;;  %v3608_v50 = vld [vmem:[#allocation75_spill] sm:$0xff]  ;;  %v3610_v52 = vld [vmem:[#allocation73_spill] sm:$0xff] }
  0xee   : > { %762 = vmatpush.msrb.mxu0 %v3600_v55  ;;  %801 = vmatpush.msrb.mxu2 %v3602_v43  ;;  %v3611_v55 = vld [vmem:[#allocation74_spill] sm:$0xff]  ;;  %v3613_v43 = vld [vmem:[#allocation80_spill] sm:$0xff] }
  0xef   : > { %782 = vmatpush.msrb.mxu1 %v3601_v63  ;;  %821 = vmatpush.msrb.mxu3 %v3603_v42  ;;  %v3612_v63 = vld [vmem:[#allocation79_spill] sm:$0xff]  ;;  %v3614_v42 = vld [vmem:[#allocation77_spill] sm:$0xff] }
  0xf0   : > { %763 = vmatpush.msrb.mxu0 %v3604_v46  ;;  %802 = vmatpush.msrb.mxu2 %v3606_v39  ;;  %v3615_v46 = vld [vmem:[#allocation78_spill] sm:$0xff]  ;;  %v3617_v39 = vld [vmem:[#allocation84_spill] sm:$0xff] }
  0xf1   : > { %783 = vmatpush.msrb.mxu1 %v3605_v47  ;;  %822 = vmatpush.msrb.mxu3 %v3607_v38  ;;  %v3616_v47 = vld [vmem:[#allocation83_spill] sm:$0xff]  ;;  %v3618_v38 = vld [vmem:[#allocation81_spill] sm:$0xff] }
  0xf2   : > { %764 = vmatpush.msrb.mxu0 %v3608_v50  ;;  %803 = vmatpush.msrb.mxu2 %v3610_v52  ;;  %v3619_v50 = vld [vmem:[#allocation82_spill] sm:$0xff]  ;;  %v3621_v52 = vld [vmem:[#allocation88_spill] sm:$0xff] }
  0xf3   : > { %784 = vmatpush.msrb.mxu1 %v3609_v51  ;;  %823 = vmatpush.msrb.mxu3 %v3611_v55  ;;  %v3620_v51 = vld [vmem:[#allocation87_spill] sm:$0xff]  ;;  %v3622_v55 = vld [vmem:[#allocation85_spill] sm:$0xff] }
  0xf4   : > { %765 = vmatpush.msrb.mxu0 %v3612_v63  ;;  %804 = vmatpush.msrb.mxu2 %v3614_v42  ;;  %v3623_v63 = vld [vmem:[#allocation86_spill] sm:$0xff]  ;;  %v3625_v42 = vld [vmem:[#allocation92_spill] sm:$0xff] }
  0xf5   : > { %785 = vmatpush.msrb.mxu1 %v3613_v43  ;;  %824 = vmatpush.msrb.mxu3 %v3615_v46  ;;  %v3624_v43 = vld [vmem:[#allocation91_spill] sm:$0xff]  ;;  %v3626_v46 = vld [vmem:[#allocation89_spill] sm:$0xff] }
  0xf6   : > { %766 = vmatpush.msrb.mxu0 %v3616_v47  ;;  %805 = vmatpush.msrb.mxu2 %v3618_v38  ;;  %v3627_v47 = vld [vmem:[#allocation90_spill] sm:$0xff]  ;;  %v3629_v38 = vld [vmem:[#allocation96_spill] sm:$0xff] }
  0xf7   : > { %786 = vmatpush.msrb.mxu1 %v3617_v39  ;;  %825 = vmatpush.msrb.mxu3 %v3619_v50  ;;  %v3628_v39 = vld [vmem:[#allocation95_spill] sm:$0xff]  ;;  %v3630_v50 = vld [vmem:[#allocation93_spill] sm:$0xff] }
  0xf8   : > { %767 = vmatpush.msrb.mxu0 %v3620_v51  ;;  %806 = vmatpush.msrb.mxu2 %v3622_v55  ;;  %v3632_v55 = vld [vmem:[#allocation99_spill] sm:$0xff] }
  0xf9   : > { %787 = vmatpush.msrb.mxu1 %v3621_v52  ;;  %826 = vmatpush.msrb.mxu3 %v3623_v63  ;;  %v3631_v52 = vld [vmem:[#allocation94_spill] sm:$0xff]  ;;  %v3633_v63 = vld [vmem:[#allocation97_spill] sm:$0xff] }
  0xfa   : > { %768 = vmatpush.msrb.mxu0 %v3624_v43  ;;  %807 = vmatpush.msrb.mxu2 %v3626_v46  ;;  %v2787_v43 = vstv %s1485_s0 }
  0xfb   : > { %788 = vmatpush.msrb.mxu1 %v3625_v42  ;;  %827 = vmatpush.msrb.mxu3 %v3627_v47  ;;  %v3634_v42 = vld [vmem:[#allocation98_spill] sm:$0xff]  ;;  %v3637_v47 = vld [vmem:[#allocation39_spill] sm:$0xff] }
  0xfc   : > { %769 = vmatpush.msrb.mxu0 %v3628_v39  ;;  %808 = vmatpush.msrb.mxu2 %v3630_v50  ;;  %v2771_v50 = vstv %s460_s30  ;;  %v2785_v39 = vld [vmem:[%s2084_s25 + $0x3] sm:$0x1] }
  0xfd   : > { %789 = vmatpush.msrb.mxu1 %v3629_v38  ;;  %828 = vmatpush.msrb.mxu3 %v3631_v52  ;;  %v2766_v52 = vld [vmem:[%s2084_s25] sm:$0x1]  ;;  %v2782_v38 = vld [vmem:[%s2084_s25 + $0x2] sm:$0x1] }
  0xfe   : > { %770 = vmatpush.msrb.mxu0 %v3632_v55  ;;  %809 = vmatpush.msrb.mxu2 %v3633_v63  ;;  %3635 = vst [vmem:[#allocation111_spill] sm:$0xff] %v2766_v52  ;;  %v2769_v63 = vld [vmem:[%s2084_s25 + $0x1] sm:$0x1] }
  0xff   : > { %790 = vmatpush.msrb.mxu1 %v2589_v54  ;;  %829 = vmatpush.msrb.mxu3 %v3634_v42  ;;  %3636 = vst [vmem:[#allocation112_spill] sm:$0xff] %v2769_v63  ;;  %v3638_v54 = vld [vmem:[#allocation40_spill] sm:$0xff] }
 0x100   : > { %771 = vmatpush.msrb.mxu0 %v2602_v59  ;;  %810 = vmatpush.msrb.mxu2 %v2594_v57  ;;  %v479_v42 = vpop.f32.mrf.mxu0  ;;  %v2777_v59 = vstv %s647_s2 }
 0x101   : > { %791 = vmatpush.msrb.mxu1 %v2605_v58  ;;  %830 = vmatpush.msrb.mxu3 %v2597_v56  ;;  %v499_v58 = vpop.f32.mrf.mxu1  ;;  %v622_v57 = vsub.f32 %v479_v42, %v2766_v52 }
 0x102   : > { %811 = vmatpush.msrb.mxu2 %v2610_v60  ;;  %v623_v56 = vsub.f32 %v499_v58, %v2769_v63 }
 0x103   : > { %831 = vmatpush.msrb.mxu3 %v2613_v61  ;;  %v631_v60 = vmul.f32 %v2771_v50, %v622_v57 }
 0x104   : > { %v632_v61 = vmul.f32 %v2771_v50, %v623_v56 }
 0x105   : > { %v639_v46 = vsub.f32 %v3637_v47, %v631_v60 }
 0x106   : > { %v640_v55 = vsub.f32 %v3638_v54, %v632_v61 }
 0x107   : > { %v649_v42 = vmax.f32 %v2777_v59, %v639_v46 }
 0x108   : > { %v650_v58 = vmax.f32 %v2777_v59, %v640_v55  ;;  %v519_v63 = vpop.f32.mrf.mxu2  ;;  %v539_v57 = vpop.f32.mrf.mxu3 }
 0x109   : > { %v624_v56 = vsub.f32 %v519_v63, %v2782_v38  ;;  %v625_v52 = vsub.f32 %v539_v57, %v2785_v39  ;;  %v658_v47 = vmin.f32 %v2787_v43, %v649_v42  ;;  %v3660_v57 = vld [vmem:[#allocation25_spill] sm:$0xff] }
 0x10a   : > { %v659_v54 = vmin.f32 %v2787_v43, %v650_v58 }
 0x10b   : > { %v633_v60 = vmul.f32 %v2771_v50, %v624_v56  ;;  %v634_v61 = vmul.f32 %v2771_v50, %v625_v52  ;;  %v2797_v51 = vsub.f32 %v639_v46, %v658_v47  ;;  %v3661_v56 = vld [vmem:[#allocation26_spill] sm:$0xff] }
 0x10c   : > { %v2799_v49 = vsub.f32 %v640_v55, %v659_v54  ;;  %v3662_v54 = vld [vmem:[#allocation43_spill] sm:$0xff] }
 0x10d   : > { %v641_v62 = vsub.f32 %v3639_v48, %v633_v60  ;;  %v642_v35 = vsub.f32 %v3640_v53, %v634_v61  ;;  %692 = vmatmul.f32.vlgmr.msra.gmra.mxu0 %v2797_v51  ;;  %v3663_v60 = vld [vmem:[#allocation44_spill] sm:$0xff]  ;;  %v3664_v61 = vld [vmem:[#allocation29_spill] sm:$0xff] }
 0x10e   : > { %712 = vmatmul.f32.vlgmr.msra.gmra.mxu1 %v2799_v49  ;;  %890 = vmatpush.msra.mxu0 %v2094_v0  ;;  %v2844_v0 = vld [vmem:[%s2084_s25 + $0x4] sm:$0x1] }
 0x10f   : > { %v651_v63 = vmax.f32 %v2777_v59, %v641_v62  ;;  %v652_v42 = vmax.f32 %v2777_v59, %v642_v35  ;;  %910 = vmatpush.msra.mxu1 %v2097_v1  ;;  %v2847_v1 = vld [vmem:[%s2084_s25 + $0x5] sm:$0x1] }
 0x110   : > { %891 = vmatpush.msra.mxu0 %v2108_v4 }
 0x111   : > { %v660_v46 = vmin.f32 %v2787_v43, %v651_v63  ;;  %v661_v52 = vmin.f32 %v2787_v43, %v652_v42  ;;  %911 = vmatpush.msra.mxu1 %v2111_v5  ;;  %v3665_v63 = vld [vmem:[#allocation30_spill] sm:$0xff] }
 0x112   : > { %892 = vmatpush.msra.mxu0 %v2122_v8  ;;  %v3641_v8 = vld [vmem:[#allocation16_spill] sm:$0xff] }
 0x113   : > { %v2813_v48 = vsub.f32 %v641_v62, %v660_v46  ;;  %v2815_v53 = vsub.f32 %v642_v35, %v661_v52  ;;  %912 = vmatpush.msra.mxu1 %v2127_v9  ;;  %v3642_v9 = vld [vmem:[#allocation107_spill] sm:$0xff]  ;;  %v3654_v35 = vld [vmem:[#allocation21_spill] sm:$0xff]  ;;  %v3659_v62 = vld [vmem:[#allocation110_spill] sm:$0xff] }
 0x114   : > { %893 = vmatpush.msra.mxu0 %v2138_v12  ;;  %v3666_v52 = vld [vmem:[#allocation47_spill] sm:$0xff] }
 0x115   : > { %732 = vmatmul.f32.vlgmr.msra.gmra.mxu2 %v2813_v48  ;;  %752 = vmatmul.f32.vlgmr.msra.gmra.mxu3 %v2815_v53 }
 0x116   : > { %913 = vmatpush.msra.mxu1 %v2141_v13  ;;  %930 = vmatpush.msra.mxu2 %v2100_v2  ;;  %v2870_v13 = vld [vmem:[%s2084_s25 + $0x6] sm:$0x1] }
 0x117   : > { %950 = vmatpush.msra.mxu3 %v2105_v3  ;;  %894 = vmatpush.msra.mxu0 %v2154_v16  ;;  %v3645_v16 = vld [vmem:[#allocation24_spill] sm:$0xff] }
 0x118   : > { %914 = vmatpush.msra.mxu1 %v2157_v17  ;;  %931 = vmatpush.msra.mxu2 %v2116_v6  ;;  %v3646_v17 = vld [vmem:[#allocation17_spill] sm:$0xff] }
 0x119   : > { %951 = vmatpush.msra.mxu3 %v2119_v7  ;;  %895 = vmatpush.msra.mxu0 %v2170_v20 }
 0x11a   : > { %915 = vmatpush.msra.mxu1 %v2173_v21  ;;  %932 = vmatpush.msra.mxu2 %v2130_v10 }
 0x11b   : > { %952 = vmatpush.msra.mxu3 %v2133_v11  ;;  %896 = vmatpush.msra.mxu0 %v2186_v24  ;;  %v3643_v11 = vld [vmem:[#allocation108_spill] sm:$0xff] }
 0x11c   : > { %916 = vmatpush.msra.mxu1 %v2189_v25  ;;  %933 = vmatpush.msra.mxu2 %v2146_v14  ;;  %v2873_v14 = vld [vmem:[%s2084_s25 + $0x7] sm:$0x1]  ;;  %s1335_s25 = scalar_lea.hbm %s3290_s4, %s1493_s29 }
 0x11d   : > { %953 = vmatpush.msra.mxu3 %v2149_v15  ;;  %897 = vmatpush.msra.mxu0 %v2202_v28  ;;  %v3644_v15 = vld [vmem:[#allocation23_spill] sm:$0xff]  ;;  %v3649_v24 = vld [vmem:[#allocation28_spill] sm:$0xff] }
 0x11e   : > { %917 = vmatpush.msra.mxu1 %v2205_v29  ;;  %934 = vmatpush.msra.mxu2 %v2162_v18  ;;  %v3647_v18 = vld [vmem:[#allocation18_spill] sm:$0xff]  ;;  %v3651_v28 = vld [vmem:[#allocation20_spill] sm:$0xff] }
 0x11f   : > { %954 = vmatpush.msra.mxu3 %v2165_v19  ;;  %898 = vmatpush.msra.mxu0 %v2218_v32  ;;  %v3653_v32 = vld [vmem:[#allocation32_spill] sm:$0xff] }
 0x120   : > { %918 = vmatpush.msra.mxu1 %v2221_v33  ;;  %935 = vmatpush.msra.mxu2 %v2178_v22 }
 0x121   : > { %955 = vmatpush.msra.mxu3 %v2181_v23  ;;  %899 = vmatpush.msra.mxu0 %v2234_v36  ;;  %v3648_v23 = vld [vmem:[#allocation27_spill] sm:$0xff]  ;;  %v3655_v36 = vld [vmem:[#allocation22_spill] sm:$0xff] }
 0x122   : > { %919 = vmatpush.msra.mxu1 %v2237_v37  ;;  %936 = vmatpush.msra.mxu2 %v2194_v26 }
 0x123   : > { %956 = vmatpush.msra.mxu3 %v2197_v27  ;;  %900 = vmatpush.msra.mxu0 %v2250_v40  ;;  %v3650_v27 = vld [vmem:[#allocation19_spill] sm:$0xff] }
 0x124   : > { %920 = vmatpush.msra.mxu1 %v2253_v41  ;;  %937 = vmatpush.msra.mxu2 %v2210_v30  ;;  %v3656_v41 = vld [vmem:[#allocation35_spill] sm:$0xff] }
 0x125   : > { %957 = vmatpush.msra.mxu3 %v2213_v31  ;;  %901 = vmatpush.msra.mxu0 %v2266_v44  ;;  %v3652_v31 = vld [vmem:[#allocation31_spill] sm:$0xff]  ;;  %v3657_v44 = vld [vmem:[#allocation36_spill] sm:$0xff] }
 0x126   : > { %921 = vmatpush.msra.mxu1 %v2269_v45  ;;  %938 = vmatpush.msra.mxu2 %v2226_v34  ;;  %v3658_v45 = vld [vmem:[#allocation109_spill] sm:$0xff] }
 0x127   : > { %958 = vmatpush.msra.mxu3 %v3641_v8  ;;  %902 = vmatpush.msra.mxu0 %v3644_v15  ;;  %v3672_v8 = vld [vmem:[#allocation37_spill] sm:$0xff]  ;;  %v3678_v15 = vld [vmem:[#allocation59_spill] sm:$0xff] }
 0x128   : > { %922 = vmatpush.msra.mxu1 %v3645_v16  ;;  %939 = vmatpush.msra.mxu2 %v3646_v17  ;;  %v3679_v16 = vld [vmem:[#allocation60_spill] sm:$0xff]  ;;  %v3680_v17 = vld [vmem:[#allocation49_spill] sm:$0xff] }
 0x129   : > { %959 = vmatpush.msra.mxu3 %v3647_v18  ;;  %903 = vmatpush.msra.mxu0 %v3648_v23  ;;  %v3681_v18 = vld [vmem:[#allocation50_spill] sm:$0xff]  ;;  %v3686_v23 = vld [vmem:[#allocation67_spill] sm:$0xff] }
 0x12a   : > { %923 = vmatpush.msra.mxu1 %v3649_v24  ;;  %940 = vmatpush.msra.mxu2 %v3650_v27  ;;  %v3687_v24 = vld [vmem:[#allocation68_spill] sm:$0xff]  ;;  %v3690_v27 = vld [vmem:[#allocation71_spill] sm:$0xff] }
 0x12b   : > { %960 = vmatpush.msra.mxu3 %v3651_v28  ;;  %904 = vmatpush.msra.mxu0 %v3652_v31  ;;  %v3691_v28 = vld [vmem:[#allocation72_spill] sm:$0xff]  ;;  %v3694_v31 = vld [vmem:[#allocation75_spill] sm:$0xff] }
 0x12c   : > { %924 = vmatpush.msra.mxu1 %v3653_v32  ;;  %941 = vmatpush.msra.mxu2 %v3654_v35  ;;  %v3695_v32 = vld [vmem:[#allocation76_spill] sm:$0xff]  ;;  %v3698_v35 = vld [vmem:[#allocation79_spill] sm:$0xff] }
 0x12d   : > { %961 = vmatpush.msra.mxu3 %v3655_v36  ;;  %905 = vmatpush.msra.mxu0 %v3656_v41  ;;  %v3699_v36 = vld [vmem:[#allocation80_spill] sm:$0xff]  ;;  %v3700_v41 = vld [vmem:[#allocation69_spill] sm:$0xff] }
 0x12e   : > { %925 = vmatpush.msra.mxu1 %v3657_v44  ;;  %942 = vmatpush.msra.mxu2 %v3660_v57  ;;  %v3701_v44 = vld [vmem:[#allocation70_spill] sm:$0xff]  ;;  %v3706_v57 = vld [vmem:[#allocation87_spill] sm:$0xff] }
 0x12f   : > { %962 = vmatpush.msra.mxu3 %v3661_v56  ;;  %v3707_v56 = vld [vmem:[#allocation88_spill] sm:$0xff] }
 0x130   : > { %943 = vmatpush.msra.mxu2 %v3664_v61  ;;  %v3712_v61 = vld [vmem:[#allocation81_spill] sm:$0xff] }
 0x131   : > { %963 = vmatpush.msra.mxu3 %v3665_v63  ;;  %v3713_v63 = vld [vmem:[#allocation82_spill] sm:$0xff] }
 0x13d   : > { %v559_v2 = vpop.f32.mrf.mxu0 }
 0x13e   : > { %v626_v4 = vsub.f32 %v559_v2, %v2844_v0  ;;  %v3667_v2 = vld [vmem:[#allocation48_spill] sm:$0xff] }
 0x13f   : > { %v579_v3 = vpop.f32.mrf.mxu1 }
 0x140   : > { %v627_v5 = vsub.f32 %v579_v3, %v2847_v1  ;;  %v635_v6 = vmul.f32 %v2771_v50, %v626_v4  ;;  %v3668_v3 = vld [vmem:[#allocation33_spill] sm:$0xff]  ;;  %v3669_v4 = vld [vmem:[#allocation34_spill] sm:$0xff] }
 0x141   : > { %944 = vmatpush.msra.mxu2 %v3668_v3  ;;  %964 = vmatpush.msra.mxu3 %v3669_v4  ;;  %v3718_v3 = vld [vmem:[#allocation99_spill] sm:$0xff]  ;;  %v3719_v4 = vld [vmem:[#allocation100_spill] sm:$0xff] }
 0x142   : > { %v636_v7 = vmul.f32 %v2771_v50, %v627_v5  ;;  %v643_v10 = vsub.f32 %v3642_v9, %v635_v6  ;;  %v3670_v6 = vld [vmem:[#allocation51_spill] sm:$0xff]  ;;  %v3673_v9 = vld [vmem:[#allocation38_spill] sm:$0xff] }
 0x143   : > { %945 = vmatpush.msra.mxu2 %v3672_v8  ;;  %965 = vmatpush.msra.mxu3 %v3673_v9  ;;  %v3722_v8 = vld [vmem:[#allocation103_spill] sm:$0xff]  ;;  %v3723_v9 = vld [vmem:[#allocation104_spill] sm:$0xff] }
 0x144   : > { %v644_v12 = vsub.f32 %v3643_v11, %v636_v7  ;;  %v653_v19 = vmax.f32 %v2777_v59, %v643_v10  ;;  %v3671_v7 = vld [vmem:[#allocation52_spill] sm:$0xff]  ;;  %v3676_v11 = vld [vmem:[#allocation45_spill] sm:$0xff] }
 0x146   : > { %v654_v20 = vmax.f32 %v2777_v59, %v644_v12  ;;  %v599_v21 = vpop.f32.mrf.mxu2  ;;  %v662_v29 = vmin.f32 %v2787_v43, %v653_v19  ;;  %v3682_v19 = vld [vmem:[#allocation63_spill] sm:$0xff] }
 0x147   : > { %v619_v22 = vpop.f32.mrf.mxu3  ;;  %v628_v25 = vsub.f32 %v599_v21, %v2870_v13  ;;  %v3684_v21 = vld [vmem:[#allocation53_spill] sm:$0xff] }
 0x148   : > { %v629_v26 = vsub.f32 %v619_v22, %v2873_v14  ;;  %v663_v30 = vmin.f32 %v2787_v43, %v654_v20  ;;  %v2895_v37 = vsub.f32 %v643_v10, %v662_v29  ;;  %v3675_v10 = vld [vmem:[#allocation56_spill] sm:$0xff]  ;;  %v3685_v22 = vld [vmem:[#allocation54_spill] sm:$0xff]  ;;  %v3692_v29 = vld [vmem:[#allocation61_spill] sm:$0xff] }
 0x149   : > { %v637_v33 = vmul.f32 %v2771_v50, %v628_v25  ;;  %v3683_v20 = vld [vmem:[#allocation64_spill] sm:$0xff]  ;;  %v3688_v25 = vld [vmem:[#allocation57_spill] sm:$0xff] }
 0x14a   : > { %v638_v34 = vmul.f32 %v2771_v50, %v629_v26  ;;  %v2897_v40 = vsub.f32 %v644_v12, %v663_v30  ;;  %772 = vmatmul.f32.vlgmr.msrb.gmra.mxu0 %v2895_v37  ;;  %v3677_v12 = vld [vmem:[#allocation46_spill] sm:$0xff] }
 0x14b   : > { %v645_v55 = vsub.f32 %v3658_v45, %v637_v33  ;;  %970 = vmatpush.msrb.mxu0 %v3662_v54  ;;  %v3689_v26 = vld [vmem:[#allocation58_spill] sm:$0xff]  ;;  %v3696_v33 = vld [vmem:[#allocation65_spill] sm:$0xff]  ;;  %v3702_v45 = vld [vmem:[#allocation83_spill] sm:$0xff] }
 0x14c   : > { %v646_v58 = vsub.f32 %v3659_v62, %v638_v34  ;;  %792 = vmatmul.f32.vlgmr.msrb.gmra.mxu1 %v2897_v40  ;;  %v3693_v30 = vld [vmem:[#allocation62_spill] sm:$0xff]  ;;  %v3704_v62 = vld [vmem:[#allocation73_spill] sm:$0xff]  ;;  %v3710_v54 = vld [vmem:[#allocation91_spill] sm:$0xff] }
 0x14d   : > { %v655_v50 = vmax.f32 %v2777_v59, %v645_v55  ;;  %990 = vmatpush.msrb.mxu1 %v3663_v60  ;;  %971 = vmatpush.msrb.mxu0 %v3666_v52  ;;  %v3697_v34 = vld [vmem:[#allocation66_spill] sm:$0xff]  ;;  %v3711_v60 = vld [vmem:[#allocation92_spill] sm:$0xff]  ;;  %v3716_v52 = vld [vmem:[#allocation85_spill] sm:$0xff] }
 0x14e   : > { %v656_v47 = vmax.f32 %v2777_v59, %v646_v58 }
 0x14f   : > { %v664_v42 = vmin.f32 %v2787_v43, %v655_v50  ;;  %991 = vmatpush.msrb.mxu1 %v3667_v2  ;;  %972 = vmatpush.msrb.mxu0 %v3670_v6  ;;  %v3708_v50 = vld [vmem:[#allocation77_spill] sm:$0xff]  ;;  %v3717_v2 = vld [vmem:[#allocation86_spill] sm:$0xff] }
 0x150   : > { %v665_v46 = vmin.f32 %v2787_v43, %v656_v47  ;;  %v3674_v43 = vld [vmem:[#allocation55_spill] sm:$0xff]  ;;  %v3709_v47 = vld [vmem:[#allocation78_spill] sm:$0xff]  ;;  %v3720_v6 = vld [vmem:[#allocation89_spill] sm:$0xff] }
 0x151   : > { %v2919_v59 = vsub.f32 %v645_v55, %v664_v42  ;;  %992 = vmatpush.msrb.mxu1 %v3671_v7  ;;  %973 = vmatpush.msrb.mxu0 %v3674_v43  ;;  %v3703_v55 = vld [vmem:[#allocation84_spill] sm:$0xff]  ;;  %v3714_v42 = vld [vmem:[#allocation95_spill] sm:$0xff]  ;;  %v3721_v7 = vld [vmem:[#allocation90_spill] sm:$0xff] }
 0x152   : > { %v2921_v5 = vsub.f32 %v646_v58, %v665_v46  ;;  %v3705_v58 = vld [vmem:[#allocation74_spill] sm:$0xff]  ;;  %v3715_v46 = vld [vmem:[#allocation96_spill] sm:$0xff]  ;;  %v3724_v43 = vld [vmem:[#allocation93_spill] sm:$0xff] }
 0x153   : > { %812 = vmatmul.f32.vlgmr.msrb.gmra.mxu2 %v2919_v59  ;;  %993 = vmatpush.msrb.mxu1 %v3675_v10  ;;  %v3725_v10 = vld [vmem:[#allocation94_spill] sm:$0xff] }
 0x154   : > { %832 = vmatmul.f32.vlgmr.msrb.gmra.mxu3 %v2921_v5  ;;  %1010 = vmatpush.msrb.mxu2 %v3676_v11  ;;  %v3726_v11 = vld [vmem:[#allocation97_spill] sm:$0xff] }
 0x155   : > { %1030 = vmatpush.msrb.mxu3 %v3677_v12  ;;  %974 = vmatpush.msrb.mxu0 %v3678_v15  ;;  %v3727_v12 = vld [vmem:[#allocation98_spill] sm:$0xff]  ;;  %v3728_v15 = vld [vmem:[#allocation101_spill] sm:$0xff] }
 0x156   : > { %994 = vmatpush.msrb.mxu1 %v3679_v16  ;;  %1011 = vmatpush.msrb.mxu2 %v3680_v17  ;;  %v3729_v16 = vld [vmem:[#allocation102_spill] sm:$0xff]  ;;  %v3730_v17 = vld [vmem:[#allocation105_spill] sm:$0xff] }
 0x157   : > { %1031 = vmatpush.msrb.mxu3 %v3681_v18  ;;  %975 = vmatpush.msrb.mxu0 %v3682_v19  ;;  %v3731_v18 = vld [vmem:[#allocation106_spill] sm:$0xff] }
 0x158   : > { %995 = vmatpush.msrb.mxu1 %v3683_v20  ;;  %1012 = vmatpush.msrb.mxu2 %v3684_v21  ;;  %v2987_v20 = vstv %s1486_s24 }
 0x159   : > { %1032 = vmatpush.msrb.mxu3 %v3685_v22  ;;  %976 = vmatpush.msrb.mxu0 %v3686_v23  ;;  %v3732_v22 = vld [vmem:[#allocation111_spill] sm:$0xff] }
 0x15a   : > { %996 = vmatpush.msrb.mxu1 %v3687_v24  ;;  %1013 = vmatpush.msrb.mxu2 %v3688_v25  ;;  %v3733_v24 = vld [vmem:[#allocation112_spill] sm:$0xff] }
 0x15b   : > { %1033 = vmatpush.msrb.mxu3 %v3689_v26  ;;  %977 = vmatpush.msrb.mxu0 %v3690_v27 }
 0x15c   : > { %997 = vmatpush.msrb.mxu1 %v3691_v28  ;;  %1014 = vmatpush.msrb.mxu2 %v3692_v29  ;;  %v2993_v28 = vstv %s861_s21 }
 0x15d   : > { %1034 = vmatpush.msrb.mxu3 %v3693_v30  ;;  %978 = vmatpush.msrb.mxu0 %v3694_v31  ;;  %v2997_v31 = vstv %s1487_s14  ;;  %s1824_s14 = scalar_lea.hbm %s3290_s4, 16 }
 0x15e   : > { %998 = vmatpush.msrb.mxu1 %v3695_v32  ;;  %1015 = vmatpush.msrb.mxu2 %v3696_v33 }
 0x15f   : > { %1035 = vmatpush.msrb.mxu3 %v3697_v34  ;;  %979 = vmatpush.msrb.mxu0 %v3698_v35 }
 0x160   : > { %999 = vmatpush.msrb.mxu1 %v3699_v36  ;;  %1016 = vmatpush.msrb.mxu2 %v3700_v41 }
 0x161   : > { %1036 = vmatpush.msrb.mxu3 %v3701_v44  ;;  %980 = vmatpush.msrb.mxu0 %v3702_v45 }
 0x162   : > { %1000 = vmatpush.msrb.mxu1 %v3703_v55  ;;  %1017 = vmatpush.msrb.mxu2 %v3704_v62  ;;  %v1571_v55 = vld [vmem:[%s2091_s13 + $0x78] sm:$0xff] }
 0x163   : > { %1037 = vmatpush.msrb.mxu3 %v3705_v58  ;;  %981 = vmatpush.msrb.mxu0 %v3706_v57  ;;  %v1572_v62 = vld [vmem:[%s2091_s13 + $0xf8] sm:$0xff] }
 0x164   : > { %1001 = vmatpush.msrb.mxu1 %v3707_v56  ;;  %1018 = vmatpush.msrb.mxu2 %v3708_v50  ;;  %v1573_v56 = vld [vmem:[%s2091_s13 + $0x70] sm:$0xff] }
 0x165   : > { %1038 = vmatpush.msrb.mxu3 %v3709_v47  ;;  %982 = vmatpush.msrb.mxu0 %v3710_v54  ;;  %v1574_v50 = vld [vmem:[%s2091_s13 + $0xf0] sm:$0xff] }
 0x166   : > { %1002 = vmatpush.msrb.mxu1 %v3711_v60  ;;  %1019 = vmatpush.msrb.mxu2 %v3712_v61  ;;  %v1575_v60 = vld [vmem:[%s2091_s13 + $0x68] sm:$0xff] }
 0x167   : > { %1039 = vmatpush.msrb.mxu3 %v3713_v63  ;;  %983 = vmatpush.msrb.mxu0 %v3714_v42  ;;  %v1576_v61 = vld [vmem:[%s2091_s13 + $0xe8] sm:$0xff] }
 0x168   : > { %1003 = vmatpush.msrb.mxu1 %v3715_v46  ;;  %1020 = vmatpush.msrb.mxu2 %v3716_v52  ;;  %v1577_v46 = vld [vmem:[%s2091_s13 + $0x60] sm:$0xff] }
 0x169   : > { %1040 = vmatpush.msrb.mxu3 %v3717_v2  ;;  %984 = vmatpush.msrb.mxu0 %v3718_v3  ;;  %v1578_v52 = vld [vmem:[%s2091_s13 + $0xe0] sm:$0xff]  ;;  %v1579_v2 = vld [vmem:[%s2091_s13 + $0x58] sm:$0xff] }
 0x16a   : > { %1004 = vmatpush.msrb.mxu1 %v3719_v4  ;;  %1021 = vmatpush.msrb.mxu2 %v3720_v6  ;;  %v1580_v3 = vld [vmem:[%s2091_s13 + $0xd8] sm:$0xff] }
 0x16b   : > { %1041 = vmatpush.msrb.mxu3 %v3721_v7  ;;  %985 = vmatpush.msrb.mxu0 %v3722_v8  ;;  %v1581_v7 = vld [vmem:[%s2091_s13 + $0x50] sm:$0xff] }
 0x16c   : > { %1005 = vmatpush.msrb.mxu1 %v3723_v9  ;;  %1022 = vmatpush.msrb.mxu2 %v3724_v43  ;;  %v1582_v8 = vld [vmem:[%s2091_s13 + $0xd0] sm:$0xff]  ;;  %v1583_v9 = vld [vmem:[%s2091_s13 + $0x48] sm:$0xff] }
 0x16d   : > { %1042 = vmatpush.msrb.mxu3 %v3725_v10  ;;  %v1584_v43 = vld [vmem:[%s2091_s13 + $0xc8] sm:$0xff]  ;;  %v1585_v10 = vld [vmem:[%s2091_s13 + $0x178] sm:$0xff] }
 0x16e   : > { %1023 = vmatpush.msrb.mxu2 %v3726_v11  ;;  %v1586_v11 = vld [vmem:[%s2091_s13 + $0x1f8] sm:$0xff] }
 0x16f   : > { %1043 = vmatpush.msrb.mxu3 %v3727_v12  ;;  %v1587_v12 = vld [vmem:[%s2091_s13 + $0x40] sm:$0xff] }
 0x170   : > { %1024 = vmatpush.msrb.mxu2 %v3728_v15  ;;  %v1588_v15 = vld [vmem:[%s2091_s13 + $0xc0] sm:$0xff] }
 0x171   : > { %1044 = vmatpush.msrb.mxu3 %v3729_v16  ;;  %v1589_v16 = vld [vmem:[%s2091_s13 + $0x170] sm:$0xff] }
 0x172   : > { %1025 = vmatpush.msrb.mxu2 %v3730_v17  ;;  %v1590_v17 = vld [vmem:[%s2091_s13 + $0x1f0] sm:$0xff] }
 0x173   : > { %1045 = vmatpush.msrb.mxu3 %v3731_v18  ;;  %v1591_v18 = vld [vmem:[%s2091_s13 + $0x38] sm:$0xff] }
 0x18a   : > { %v693_v19 = vpop.f32.mrf.mxu0 }
 0x18b   : > { %v713_v21 = vpop.f32.mrf.mxu1  ;;  %v836_v23 = vsub.f32 %v693_v19, %v3732_v22  ;;  %v1592_v19 = vld [vmem:[%s2091_s13 + $0xb8] sm:$0xff] }
 0x18c   : > { %v837_v25 = vsub.f32 %v713_v21, %v3733_v24  ;;  %v1593_v21 = vld [vmem:[%s2091_s13 + $0x168] sm:$0xff] }
 0x18d   : > { %v845_v26 = vmul.f32 %v2987_v20, %v836_v23  ;;  %v1594_v23 = vld [vmem:[%s2091_s13 + $0x1e8] sm:$0xff] }
 0x18e   : > { %v846_v27 = vmul.f32 %v2987_v20, %v837_v25  ;;  %v1595_v25 = vld [vmem:[%s2091_s13 + $0x30] sm:$0xff] }
 0x18f   : > { %v853_v29 = vsub.f32 %v2797_v51, %v845_v26  ;;  %v1596_v26 = vld [vmem:[%s2091_s13 + $0xb0] sm:$0xff] }
 0x190   : > { %v854_v30 = vsub.f32 %v2799_v49, %v846_v27 }
 0x191   : > { %v863_v32 = vmax.f32 %v2993_v28, %v853_v29 }
 0x192   : > { %v864_v33 = vmax.f32 %v2993_v28, %v854_v30 }
 0x193   : > { %v872_v34 = vmin.f32 %v2997_v31, %v863_v32  ;;  %v1598_v32 = vld [vmem:[%s2091_s13 + $0x1e0] sm:$0xff] }
 0x194   : > { %v873_v35 = vmin.f32 %v2997_v31, %v864_v33 }
 0x195   : > { %v3003_v36 = vsub.f32 %v853_v29, %v872_v34 }
 0x196   : > { %v3005_v41 = vsub.f32 %v854_v30, %v873_v35  ;;  %v1597_v30 = vld [vmem:[%s2091_s13 + $0x160] sm:$0xff]  ;;  %v1599_v35 = vld [vmem:[%s2091_s13 + $0x28] sm:$0xff] }
 0x197   : > { %906 = vmatmul.f32.vlgmr.msra.gmra.mxu0 %v3003_v36 }
 0x198   : > { %v733_v51 = vpop.f32.mrf.mxu2  ;;  %v753_v44 = vpop.f32.mrf.mxu3  ;;  %926 = vmatmul.f32.vlgmr.msra.gmra.mxu1 %v3005_v41  ;;  %1104 = vmatpush.msra.mxu0 %v1571_v55 }
 0x199   : > { %v838_v49 = vsub.f32 %v733_v51, %v2782_v38  ;;  %v839_v45 = vsub.f32 %v753_v44, %v2785_v39  ;;  %1124 = vmatpush.msra.mxu1 %v1572_v62  ;;  %v1600_v51 = vld [vmem:[%s2091_s13 + $0xa8] sm:$0xff]  ;;  %v1601_v44 = vld [vmem:[%s2091_s13 + $0x158] sm:$0xff]  ;;  %v1603_v62 = vld [vmem:[%s2091_s13 + $0x20] sm:$0xff] }
 0x19a   : > { %1105 = vmatpush.msra.mxu0 %v1573_v56  ;;  %v1606_v56 = vld [vmem:[%s2091_s13 + $0x1d0] sm:$0xff] }
 0x19b   : > { %v847_v58 = vmul.f32 %v2987_v20, %v838_v49  ;;  %v848_v57 = vmul.f32 %v2987_v20, %v839_v45  ;;  %1125 = vmatpush.msra.mxu1 %v1574_v50  ;;  %v1602_v49 = vld [vmem:[%s2091_s13 + $0x1d8] sm:$0xff] }
 0x19c   : > { %1106 = vmatpush.msra.mxu0 %v1575_v60  ;;  %v1608_v60 = vld [vmem:[%s2091_s13 + $0x98] sm:$0xff] }
 0x19d   : > { %v855_v47 = vsub.f32 %v2813_v48, %v847_v58  ;;  %v856_v54 = vsub.f32 %v2815_v53, %v848_v57  ;;  %1126 = vmatpush.msra.mxu1 %v1576_v61  ;;  %v1604_v58 = vld [vmem:[%s2091_s13 + $0xa0] sm:$0xff]  ;;  %v1605_v57 = vld [vmem:[%s2091_s13 + $0x150] sm:$0xff]  ;;  %v1609_v61 = vld [vmem:[%s2091_s13 + $0x148] sm:$0xff] }
 0x19e   : > { %1107 = vmatpush.msra.mxu0 %v1577_v46 }
 0x19f   : > { %v865_v63 = vmax.f32 %v2993_v28, %v855_v47  ;;  %v866_v42 = vmax.f32 %v2993_v28, %v856_v54  ;;  %1127 = vmatpush.msra.mxu1 %v1578_v52  ;;  %v1613_v52 = vld [vmem:[%s2091_s13 + $0x140] sm:$0xff] }
 0x1a0   : > { %1108 = vmatpush.msra.mxu0 %v1579_v2 }
 0x1a1   : > { %v874_v48 = vmin.f32 %v2997_v31, %v865_v63  ;;  %v875_v53 = vmin.f32 %v2997_v31, %v866_v42  ;;  %1128 = vmatpush.msra.mxu1 %v1580_v3  ;;  %v1610_v63 = vld [vmem:[%s2091_s13 + $0x1c8] sm:$0xff] }
 0x1a2   : > { %1109 = vmatpush.msra.mxu0 %v1581_v7  ;;  %v1615_v3 = vld [vmem:[%s2091_s13 + $0x8] sm:$0xff] }
 0x1a3   : > { %v3029_v4 = vsub.f32 %v855_v47, %v874_v48  ;;  %v3031_v6 = vsub.f32 %v856_v54, %v875_v53  ;;  %1129 = vmatpush.msra.mxu1 %v1582_v8  ;;  %v1607_v54 = vld [vmem:[%s2091_s13 + $0x18] sm:$0xff]  ;;  %v1614_v48 = vld [vmem:[%s2091_s13 + $0x1c0] sm:$0xff]  ;;  %v1616_v7 = vld [vmem:[%s2091_s13 + $0x88] sm:$0xff] }
 0x1a4   : > { %1110 = vmatpush.msra.mxu0 %v1583_v9  ;;  %v1617_v8 = vld [vmem:[%s2091_s13 + $0x138] sm:$0xff] }
 0x1a5   : > { %946 = vmatmul.f32.vlgmr.msra.gmra.mxu2 %v3029_v4  ;;  %966 = vmatmul.f32.vlgmr.msra.gmra.mxu3 %v3031_v6  ;;  %v1618_v9 = vld [vmem:[%s2091_s13 + $0x1b8] sm:$0xff] }
 0x1a6   : > { %1130 = vmatpush.msra.mxu1 %v1584_v43  ;;  %1144 = vmatpush.msra.mxu2 %v1585_v10 }
 0x1a7   : > { %1164 = vmatpush.msra.mxu3 %v1586_v11  ;;  %1111 = vmatpush.msra.mxu0 %v1587_v12  ;;  %v1619_v11 = vld [vmem:[%s2091_s13] sm:$0xff] }
 0x1a8   : > { %1131 = vmatpush.msra.mxu1 %v1588_v15  ;;  %1145 = vmatpush.msra.mxu2 %v1589_v16  ;;  %v1620_v12 = vld [vmem:[%s2091_s13 + $0x80] sm:$0xff]  ;;  %v1621_v15 = vld [vmem:[%s2091_s13 + $0x130] sm:$0xff] }
 0x1a9   : > { %1165 = vmatpush.msra.mxu3 %v1590_v17  ;;  %1112 = vmatpush.msra.mxu0 %v1591_v18  ;;  %v1622_v16 = vld [vmem:[%s2091_s13 + $0x1b0] sm:$0xff] }
 0x1aa   : > { %1132 = vmatpush.msra.mxu1 %v1592_v19  ;;  %1146 = vmatpush.msra.mxu2 %v1593_v21 }
 0x1ab   : > { %1166 = vmatpush.msra.mxu3 %v1594_v23  ;;  %1113 = vmatpush.msra.mxu0 %v1595_v25  ;;  %v1623_v23 = vld [vmem:[%s2091_s13 + $0x278] sm:$0xff] }
 0x1ac   : > { %1133 = vmatpush.msra.mxu1 %v1596_v26  ;;  %1147 = vmatpush.msra.mxu2 %v1597_v30  ;;  %v1624_v25 = vld [vmem:[%s2091_s13 + $0x2f8] sm:$0xff]  ;;  %v1625_v26 = vld [vmem:[%s2091_s13 + $0x128] sm:$0xff] }
 0x1ad   : > { %1167 = vmatpush.msra.mxu3 %v1598_v32  ;;  %1114 = vmatpush.msra.mxu0 %v1599_v35  ;;  %v1627_v32 = vld [vmem:[%s2091_s13 + $0x270] sm:$0xff]  ;;  %v1630_v35 = vld [vmem:[%s2091_s13 + $0x1a0] sm:$0xff] }
 0x1ae   : > { %1134 = vmatpush.msra.mxu1 %v1600_v51  ;;  %1148 = vmatpush.msra.mxu2 %v1601_v44 }
 0x1af   : > { %1168 = vmatpush.msra.mxu3 %v1602_v49  ;;  %1115 = vmatpush.msra.mxu0 %v1603_v62  ;;  %v1631_v49 = vld [vmem:[%s2091_s13 + $0x268] sm:$0xff] }
 0x1b0   : > { %1135 = vmatpush.msra.mxu1 %v1604_v58  ;;  %1149 = vmatpush.msra.mxu2 %v1605_v57  ;;  %v1637_v57 = vld [vmem:[%s2091_s13 + $0x110] sm:$0xff] }
 0x1b1   : > { %1169 = vmatpush.msra.mxu3 %v1606_v56  ;;  %1116 = vmatpush.msra.mxu0 %v1607_v54  ;;  %v1638_v56 = vld [vmem:[%s2091_s13 + $0x190] sm:$0xff]  ;;  %v1639_v54 = vld [vmem:[%s2091_s13 + $0x258] sm:$0xff] }
 0x1b2   : > { %1136 = vmatpush.msra.mxu1 %v1608_v60  ;;  %1150 = vmatpush.msra.mxu2 %v1609_v61  ;;  %v1641_v60 = vld [vmem:[%s2091_s13 + $0x108] sm:$0xff] }
 0x1b3   : > { %1170 = vmatpush.msra.mxu3 %v1610_v63  ;;  %v1642_v61 = vld [vmem:[%s2091_s13 + $0x188] sm:$0xff] }
 0x1b4   : > { %1151 = vmatpush.msra.mxu2 %v1613_v52  ;;  %v1647_v52 = vld [vmem:[%s2091_s13 + $0x248] sm:$0xff] }
 0x1b5   : > { %1171 = vmatpush.msra.mxu3 %v1614_v48  ;;  %v1648_v48 = vld [vmem:[%s2091_s13 + $0x2c8] sm:$0xff] }
 0x1b6   : > { %1152 = vmatpush.msra.mxu2 %v1617_v8  ;;  %v1653_v8 = vld [vmem:[%s2091_s13 + $0x370] sm:$0xff] }
 0x1b7   : > { %1172 = vmatpush.msra.mxu3 %v1618_v9  ;;  %v1654_v9 = vld [vmem:[%s2091_s13 + $0x3f0] sm:$0xff] }
 0x1b8   : > { %1153 = vmatpush.msra.mxu2 %v1621_v15  ;;  %v1657_v15 = vld [vmem:[%s2091_s13 + $0x368] sm:$0xff] }
 0x1b9   : > { %1173 = vmatpush.msra.mxu3 %v1622_v16  ;;  %v1658_v16 = vld [vmem:[%s2091_s13 + $0x3e8] sm:$0xff] }
 0x1ba   : > { %1154 = vmatpush.msra.mxu2 %v1625_v26  ;;  %v1665_v26 = vld [vmem:[%s2091_s13 + $0x358] sm:$0xff] }
 0x1c7   : > { %v773_v27 = vpop.f32.mrf.mxu0 }
 0x1c8   : > { %v840_v33 = vsub.f32 %v773_v27, %v2844_v0  ;;  %v1626_v27 = vld [vmem:[%s2091_s13 + $0x1a8] sm:$0xff] }
 0x1c9   : > { %v793_v29 = vpop.f32.mrf.mxu1  ;;  %1174 = vmatpush.msra.mxu3 %v1626_v27  ;;  %v1666_v27 = vld [vmem:[%s2091_s13 + $0x3d8] sm:$0xff] }
 0x1ca   : > { %v841_v34 = vsub.f32 %v793_v29, %v2847_v1  ;;  %v849_v45 = vmul.f32 %v2987_v20, %v840_v33  ;;  %v1628_v33 = vld [vmem:[%s2091_s13 + $0x2f0] sm:$0xff] }
 0x1cb   : > { %1175 = vmatpush.msra.mxu3 %v1630_v35  ;;  %v1672_v35 = vld [vmem:[%s2091_s13 + $0x298] sm:$0xff] }
 0x1cc   : > { %v850_v55 = vmul.f32 %v2987_v20, %v841_v34  ;;  %v857_v50 = vsub.f32 %v2895_v37, %v849_v45  ;;  %v1611_v37 = vld [vmem:[%s2091_s13 + $0x10] sm:$0xff]  ;;  %v1629_v34 = vld [vmem:[%s2091_s13 + $0x120] sm:$0xff]  ;;  %v1633_v45 = vld [vmem:[%s2091_s13 + $0x118] sm:$0xff] }
 0x1cd   : > { %1117 = vmatpush.msra.mxu0 %v1611_v37  ;;  %1155 = vmatpush.msra.mxu2 %v1629_v34  ;;  %v1645_v37 = vld [vmem:[%s2091_s13 + $0x100] sm:$0xff]  ;;  %v1671_v34 = vld [vmem:[%s2091_s13 + $0x218] sm:$0xff] }
 0x1ce   : > { %v858_v47 = vsub.f32 %v2897_v40, %v850_v55  ;;  %v867_v42 = vmax.f32 %v2993_v28, %v857_v50  ;;  %v1612_v40 = vld [vmem:[%s2091_s13 + $0x90] sm:$0xff]  ;;  %v1634_v55 = vld [vmem:[%s2091_s13 + $0x198] sm:$0xff] }
 0x1cf   : > { %1137 = vmatpush.msra.mxu1 %v1612_v40  ;;  %1118 = vmatpush.msra.mxu0 %v1615_v3  ;;  %v1646_v40 = vld [vmem:[%s2091_s13 + $0x180] sm:$0xff] }
 0x1d0   : > { %v868_v46 = vmax.f32 %v2993_v28, %v858_v47  ;;  %v876_v53 = vmin.f32 %v2997_v31, %v867_v42  ;;  %1156 = vmatpush.msra.mxu2 %v1633_v45  ;;  %1176 = vmatpush.msra.mxu3 %v1634_v55  ;;  %v1651_v3 = vld [vmem:[%s2091_s13 + $0x240] sm:$0xff] }
 0x1d1   : > { %1138 = vmatpush.msra.mxu1 %v1616_v7  ;;  %1119 = vmatpush.msra.mxu0 %v1619_v11  ;;  %v1652_v7 = vld [vmem:[%s2091_s13 + $0x2c0] sm:$0xff]  ;;  %v1655_v11 = vld [vmem:[%s2091_s13 + $0x238] sm:$0xff] }
 0x1d2   : > { %v877_v2 = vmin.f32 %v2997_v31, %v868_v46  ;;  %v3083_v43 = vsub.f32 %v857_v50, %v876_v53  ;;  %1157 = vmatpush.msra.mxu2 %v1637_v57  ;;  %1177 = vmatpush.msra.mxu3 %v1638_v56  ;;  %v1643_v46 = vld [vmem:[%s2091_s13 + $0x250] sm:$0xff]  ;;  %v1649_v53 = vld [vmem:[%s2091_s13 + $0x378] sm:$0xff]  ;;  %v1677_v45 = vld [vmem:[%s2091_s13 + $0x340] sm:$0xff] }
 0x1d3   : > { %1139 = vmatpush.msra.mxu1 %v1620_v12  ;;  %v1656_v12 = vld [vmem:[%s2091_s13 + $0x2b8] sm:$0xff]  ;;  %v1678_v55 = vld [vmem:[%s2091_s13 + $0x3c0] sm:$0xff] }
 0x1d4   : > { %v3085_v10 = vsub.f32 %v858_v47, %v877_v2  ;;  %986 = vmatmul.f32.vlgmr.msrb.gmra.mxu0 %v3083_v43  ;;  %1158 = vmatpush.msra.mxu2 %v1641_v60  ;;  %v1650_v2 = vld [vmem:[%s2091_s13 + $0x3f8] sm:$0xff]  ;;  %v1683_v57 = vld [vmem:[%s2091_s13 + $0x200] sm:$0xff] }
 0x1d5   : > { %1184 = vmatpush.msrb.mxu0 %v1623_v23  ;;  %1178 = vmatpush.msra.mxu3 %v1642_v61  ;;  %v1663_v23 = vld [vmem:[%s2091_s13 + $0x228] sm:$0xff]  ;;  %v1684_v56 = vld [vmem:[%s2091_s13 + $0x280] sm:$0xff] }
 0x1d6   : > { %v813_v17 = vpop.f32.mrf.mxu2  ;;  %1006 = vmatmul.f32.vlgmr.msrb.gmra.mxu1 %v3085_v10  ;;  %1159 = vmatpush.msra.mxu2 %v1645_v37  ;;  %v1689_v60 = vld [vmem:[%s2091_s13 + $0x320] sm:$0xff]  ;;  %v1693_v37 = vld [vmem:[%s2091_s13 + $0x310] sm:$0xff] }
 0x1d7   : > { %v833_v18 = vpop.f32.mrf.mxu3  ;;  %v842_v19 = vsub.f32 %v813_v17, %v2870_v13  ;;  %1204 = vmatpush.msrb.mxu1 %v1624_v25  ;;  %1185 = vmatpush.msrb.mxu0 %v1627_v32  ;;  %v1659_v17 = vld [vmem:[%s2091_s13 + $0x230] sm:$0xff]  ;;  %v1664_v25 = vld [vmem:[%s2091_s13 + $0x2a8] sm:$0xff]  ;;  %v1690_v61 = vld [vmem:[%s2091_s13 + $0x3a0] sm:$0xff] }
 0x1d8   : > { %v843_v21 = vsub.f32 %v833_v18, %v2873_v14  ;;  %1179 = vmatpush.msra.mxu3 %v1646_v40  ;;  %v1660_v18 = vld [vmem:[%s2091_s13 + $0x2b0] sm:$0xff] }
 0x1d9   : > { %v851_v29 = vmul.f32 %v2987_v20, %v842_v19  ;;  %1205 = vmatpush.msrb.mxu1 %v1628_v33  ;;  %1186 = vmatpush.msrb.mxu0 %v1631_v49  ;;  %v1661_v19 = vld [vmem:[%s2091_s13 + $0x360] sm:$0xff]  ;;  %v1669_v32 = vld [vmem:[%s2091_s13 + $0x350] sm:$0xff] }
 0x1da   : > { %v852_v30 = vmul.f32 %v2987_v20, %v843_v21  ;;  %v1632_v20 = vld [vmem:[%s2091_s13 + $0x2e8] sm:$0xff]  ;;  %v1662_v21 = vld [vmem:[%s2091_s13 + $0x3e0] sm:$0xff]  ;;  %v1670_v33 = vld [vmem:[%s2091_s13 + $0x3d0] sm:$0xff] }
 0x1db   : > { %v859_v51 = vsub.f32 %v2919_v59, %v851_v29  ;;  %1206 = vmatpush.msrb.mxu1 %v1632_v20  ;;  %v1635_v59 = vld [vmem:[%s2091_s13 + $0x260] sm:$0xff]  ;;  %v1675_v49 = vld [vmem:[%s2091_s13 + $0x210] sm:$0xff] }
 0x1dc   : > { %v860_v44 = vsub.f32 %v2921_v5, %v852_v30  ;;  %1187 = vmatpush.msrb.mxu0 %v1635_v59  ;;  %v1636_v5 = vld [vmem:[%s2091_s13 + $0x2e0] sm:$0xff]  ;;  %v1676_v20 = vld [vmem:[%s2091_s13 + $0x290] sm:$0xff]  ;;  %v1681_v59 = vld [vmem:[%s2091_s13 + $0x338] sm:$0xff] }
 0x1dd   : > { %v869_v62 = vmax.f32 %v2993_v28, %v859_v51  ;;  %1207 = vmatpush.msrb.mxu1 %v1636_v5  ;;  %v1667_v29 = vld [vmem:[%s2091_s13 + $0x220] sm:$0xff]  ;;  %v1682_v5 = vld [vmem:[%s2091_s13 + $0x3b8] sm:$0xff]  ;;  %v1694_v40 = vld [vmem:[%s2091_s13 + $0x390] sm:$0xff] }
 0x1de   : > { %v870_v58 = vmax.f32 %v2993_v28, %v860_v44  ;;  %1188 = vmatpush.msrb.mxu0 %v1639_v54  ;;  %v1640_v28 = vld [vmem:[%s2091_s13 + $0x2d8] sm:$0xff]  ;;  %v1668_v30 = vld [vmem:[%s2091_s13 + $0x2a0] sm:$0xff]  ;;  %v1687_v54 = vld [vmem:[%s2091_s13 + $0x328] sm:$0xff] }
 0x1df   : > { %v878_v50 = vmin.f32 %v2997_v31, %v869_v62  ;;  %1208 = vmatpush.msrb.mxu1 %v1640_v28  ;;  %v1679_v62 = vld [vmem:[%s2091_s13 + $0x208] sm:$0xff] }
 0x1e0   : > { %v879_v47 = vmin.f32 %v2997_v31, %v870_v58  ;;  %1189 = vmatpush.msrb.mxu0 %v1643_v46  ;;  %v1644_v31 = vld [vmem:[%s2091_s13 + $0x2d0] sm:$0xff]  ;;  %v1680_v58 = vld [vmem:[%s2091_s13 + $0x288] sm:$0xff]  ;;  %v1691_v46 = vld [vmem:[%s2091_s13 + $0x318] sm:$0xff] }
 0x1e1   : > { %v3123_v63 = vsub.f32 %v859_v51, %v878_v50  ;;  %1209 = vmatpush.msrb.mxu1 %v1644_v31  ;;  %v1673_v51 = vld [vmem:[%s2091_s13 + $0x348] sm:$0xff]  ;;  %v1685_v50 = vld [vmem:[%s2091_s13 + $0x330] sm:$0xff]  ;;  %v1692_v31 = vld [vmem:[%s2091_s13 + $0x398] sm:$0xff] }
 0x1e2   : > { %v3125_v42 = vsub.f32 %v860_v44, %v879_v47  ;;  %1190 = vmatpush.msrb.mxu0 %v1647_v52  ;;  %v1674_v44 = vld [vmem:[%s2091_s13 + $0x3c8] sm:$0xff]  ;;  %v1686_v47 = vld [vmem:[%s2091_s13 + $0x3b0] sm:$0xff] }
 0x1e3   : > { %1026 = vmatmul.f32.vlgmr.msrb.gmra.mxu2 %v3123_v63  ;;  %1210 = vmatpush.msrb.mxu1 %v1648_v48  ;;  %v1688_v28 = vld [vmem:[%s2091_s13 + $0x3a8] sm:$0xff] }
 0x1e4   : > { %1046 = vmatmul.f32.vlgmr.msrb.gmra.mxu3 %v3125_v42  ;;  %1224 = vmatpush.msrb.mxu2 %v1649_v53  ;;  %v1695_v52 = vld [vmem:[%s2091_s13 + $0x308] sm:$0xff]  ;;  %v1697_v53 = vld [vmem:[%s2091_s13 + $0x300] sm:$0xff] }
 0x1e5   : > { %1244 = vmatpush.msrb.mxu3 %v1650_v2  ;;  %1191 = vmatpush.msrb.mxu0 %v1651_v3  ;;  %v1696_v48 = vld [vmem:[%s2091_s13 + $0x388] sm:$0xff]  ;;  %v1698_v2 = vld [vmem:[%s2091_s13 + $0x380] sm:$0xff]  ;;  %s1338_s13 = sshll.u32 %s1335_s25, 4  ;;  %s1339_s13 = int_to_ptr.hbm [resolvable:$true] %s1338_s13 }
 0x1e6   : > { %1211 = vmatpush.msrb.mxu1 %v1652_v7  ;;  %1225 = vmatpush.msrb.mxu2 %v1653_v8  ;;  %v1058_v7 = vstv %s1488_s27  ;;  %s1818_s30 = sshra.s32 %s1339_s13, 4  ;;  %s1819_s30 = int_to_ptr.hbm [resolvable:$true] %s1818_s30 }
 0x1e7   : > { %1245 = vmatpush.msrb.mxu3 %v1654_v9  ;;  %1192 = vmatpush.msrb.mxu0 %v1655_v11  ;;  %s1820_s0 = scalar_lea.hbm %s1819_s30, 8  ;;  %p1825_p9 = scmp.lt.s32.totalorder %s1819_s30, %s3290_s4 }
 0x1e8   : > { %1212 = vmatpush.msrb.mxu1 %v1656_v12  ;;  %1226 = vmatpush.msrb.mxu2 %v1657_v15  ;;  %p1821_p6 = scmp.ne.s32.totalorder %s1819_s30, %s1820_s0  ;;  %p1826_p1 = scmp.lt.s32.totalorder %s1824_s14, %s1820_s0 }
 0x1e9   : > { %1246 = vmatpush.msrb.mxu3 %v1658_v16  ;;  %1193 = vmatpush.msrb.mxu0 %v1659_v17  ;;  %v1076_v16 = vstv %s1075_s7 }
 0x1ea   : > { %1213 = vmatpush.msrb.mxu1 %v1660_v18  ;;  %1227 = vmatpush.msrb.mxu2 %v1661_v19  ;;  %v1085_v19 = vstv %s1489_s20  ;;  %p1822_p8 = pnand %p1821_p6, %p2003_p11  ;;  %p1827_p3 = por %p1826_p1, %p1825_p9 }
 0x1eb   : > { %1247 = vmatpush.msrb.mxu3 %v1662_v21  ;;  %1194 = vmatpush.msrb.mxu0 %v1663_v23 }
 0x1ec   : > { %1214 = vmatpush.msrb.mxu1 %v1664_v25  ;;  %1228 = vmatpush.msrb.mxu2 %v1665_v26  ;;  %p1823_p4 = pneg %p1822_p8 }
 0x1ed   : > { %1248 = vmatpush.msrb.mxu3 %v1666_v27  ;;  %1195 = vmatpush.msrb.mxu0 %v1667_v29 }
 0x1ee   : > { %1215 = vmatpush.msrb.mxu1 %v1668_v30  ;;  %1229 = vmatpush.msrb.mxu2 %v1669_v32  ;;  %p1828_p5 = pnand %p1827_p3, %p1823_p4 }
 0x1ef   : > { %1249 = vmatpush.msrb.mxu3 %v1670_v33  ;;  %1196 = vmatpush.msrb.mxu0 %v1671_v34 }
 0x1f0   : > { %1216 = vmatpush.msrb.mxu1 %v1672_v35  ;;  %1230 = vmatpush.msrb.mxu2 %v1673_v51 }
 0x1f1   : > { %1250 = vmatpush.msrb.mxu3 %v1674_v44  ;;  %1197 = vmatpush.msrb.mxu0 %v1675_v49 }
 0x1f2   : > { %1217 = vmatpush.msrb.mxu1 %v1676_v20  ;;  %1231 = vmatpush.msrb.mxu2 %v1677_v45 }
 0x1f3   : > { %1251 = vmatpush.msrb.mxu3 %v1678_v55  ;;  %1198 = vmatpush.msrb.mxu0 %v1679_v62 }
 0x1f4   : > { %1218 = vmatpush.msrb.mxu1 %v1680_v58  ;;  %1232 = vmatpush.msrb.mxu2 %v1681_v59 }
 0x1f5   : > { %1252 = vmatpush.msrb.mxu3 %v1682_v5  ;;  %1199 = vmatpush.msrb.mxu0 %v1683_v57 }
 0x1f6   : > { %1219 = vmatpush.msrb.mxu1 %v1684_v56  ;;  %1233 = vmatpush.msrb.mxu2 %v1685_v50 }
 0x1f7   : > { %1253 = vmatpush.msrb.mxu3 %v1686_v47 }
 0x1f8   : > { %1234 = vmatpush.msrb.mxu2 %v1687_v54 }
 0x1f9   : > { %1254 = vmatpush.msrb.mxu3 %v1688_v28 }
 0x1fa   : > { %1235 = vmatpush.msrb.mxu2 %v1689_v60 }
 0x1fb   : > { %1255 = vmatpush.msrb.mxu3 %v1690_v61 }
 0x1fc   : > { %1236 = vmatpush.msrb.mxu2 %v1691_v46 }
 0x1fd   : > { %1256 = vmatpush.msrb.mxu3 %v1692_v31 }
 0x1fe   : > { %1237 = vmatpush.msrb.mxu2 %v1693_v37 }
 0x1ff   : > { %1257 = vmatpush.msrb.mxu3 %v1694_v40 }
 0x200   : > { %1238 = vmatpush.msrb.mxu2 %v1695_v52 }
 0x201   : > { %1258 = vmatpush.msrb.mxu3 %v1696_v48 }
 0x202   : > { %1239 = vmatpush.msrb.mxu2 %v1697_v53 }
 0x203   : > { %1259 = vmatpush.msrb.mxu3 %v1698_v2 }
 0x214   : > { %v907_v3 = vpop.f32.mrf.mxu0 }
 0x215   : > { %v927_v8 = vpop.f32.mrf.mxu1  ;;  %v1050_v9 = vsub.f32 %v907_v3, %v3732_v22 }
 0x216   : > { %v1051_v11 = vsub.f32 %v927_v8, %v3733_v24 }
 0x217   : > { %v1059_v12 = vmul.f32 %v1058_v7, %v1050_v9 }
 0x218   : > { %v1060_v15 = vmul.f32 %v1058_v7, %v1051_v11 }
 0x219   : > { %v1067_v17 = vsub.f32 %v3003_v36, %v1059_v12 }
 0x21a   : > { %v1068_v18 = vsub.f32 %v3005_v41, %v1060_v15 }
 0x21b   : > { %v1077_v21 = vmax.f32 %v1076_v16, %v1067_v17 }
 0x21c   : > { %v1078_v23 = vmax.f32 %v1076_v16, %v1068_v18 }
 0x21d   : > { %v1086_v25 = vmin.f32 %v1085_v19, %v1077_v21 }
 0x21e   : > { %v1087_v26 = vmin.f32 %v1085_v19, %v1078_v23 }
 0x21f   : > { %v3189_v27 = vsub.f32 %v1067_v17, %v1086_v25  ;;  %v1299_v25 = vstv %s1491_s23 }
 0x220   : > { %v3191_v29 = vsub.f32 %v1068_v18, %v1087_v26 }
 0x221   : > { %1120 = vmatmul.f32.vlgmr.msra.gmra.mxu0 %v3189_v27 }
 0x222   : > { %1140 = vmatmul.f32.vlgmr.msra.gmra.mxu1 %v3191_v29 }
 0x228   : > { %v947_v30 = vpop.f32.mrf.mxu2  ;;  %v967_v32 = vpop.f32.mrf.mxu3 }
 0x229   : > { %v1052_v33 = vsub.f32 %v947_v30, %v2782_v38  ;;  %v1053_v36 = vsub.f32 %v967_v32, %v2785_v39 }
 0x22b   : > { %v1061_v41 = vmul.f32 %v1058_v7, %v1052_v33  ;;  %v1062_v34 = vmul.f32 %v1058_v7, %v1053_v36 }
 0x22d   : > { %v1069_v35 = vsub.f32 %v3029_v4, %v1061_v41  ;;  %v1070_v51 = vsub.f32 %v3031_v6, %v1062_v34 }
 0x22f   : > { %v1079_v44 = vmax.f32 %v1076_v16, %v1069_v35  ;;  %v1080_v49 = vmax.f32 %v1076_v16, %v1070_v51 }
 0x231   : > { %v1088_v20 = vmin.f32 %v1085_v19, %v1079_v44  ;;  %v1089_v45 = vmin.f32 %v1085_v19, %v1080_v49 }
 0x233   : > { %v3199_v55 = vsub.f32 %v1069_v35, %v1088_v20  ;;  %v3201_v62 = vsub.f32 %v1070_v51, %v1089_v45 }
 0x235   : > { %1160 = vmatmul.f32.vlgmr.msra.gmra.mxu2 %v3199_v55  ;;  %1180 = vmatmul.f32.vlgmr.msra.gmra.mxu3 %v3201_v62 }
 0x251   : > { %v987_v58 = vpop.f32.mrf.mxu0 }
 0x252   : > { %v1054_v5 = vsub.f32 %v987_v58, %v2844_v0 }
 0x253   : > { %v1007_v59 = vpop.f32.mrf.mxu1 }
 0x254   : > { %v1055_v4 = vsub.f32 %v1007_v59, %v2847_v1  ;;  %v1063_v57 = vmul.f32 %v1058_v7, %v1054_v5 }
 0x256   : > { %v1064_v6 = vmul.f32 %v1058_v7, %v1055_v4  ;;  %v1071_v56 = vsub.f32 %v3083_v43, %v1063_v57 }
 0x258   : > { %v1072_v50 = vsub.f32 %v3085_v10, %v1064_v6  ;;  %v1081_v47 = vmax.f32 %v1076_v16, %v1071_v56 }
 0x25a   : > { %v1082_v54 = vmax.f32 %v1076_v16, %v1072_v50  ;;  %v1090_v28 = vmin.f32 %v1085_v19, %v1081_v47 }
 0x25c   : > { %v1091_v60 = vmin.f32 %v1085_v19, %v1082_v54  ;;  %v3209_v61 = vsub.f32 %v1071_v56, %v1090_v28 }
 0x25e   : > { %v3211_v46 = vsub.f32 %v1072_v50, %v1091_v60  ;;  %1200 = vmatmul.f32.vlgmr.msrb.gmra.mxu0 %v3209_v61 }
 0x260   : > { %1220 = vmatmul.f32.vlgmr.msrb.gmra.mxu1 %v3211_v46 }
 0x266   : > { %v1027_v31 = vpop.f32.mrf.mxu2 }
 0x267   : > { %v1047_v37 = vpop.f32.mrf.mxu3  ;;  %v1056_v40 = vsub.f32 %v1027_v31, %v2870_v13 }
 0x268   : > { %v1057_v43 = vsub.f32 %v1047_v37, %v2873_v14 }
 0x269   : > { %v1065_v52 = vmul.f32 %v1058_v7, %v1056_v40 }
 0x26a   : > { %v1066_v10 = vmul.f32 %v1058_v7, %v1057_v43  ;;  %v1272_v7 = vstv %s1490_s22 }
 0x26b   : > { %v1073_v48 = vsub.f32 %v3123_v63, %v1065_v52 }
 0x26c   : > { %v1074_v53 = vsub.f32 %v3125_v42, %v1066_v10 }
 0x26d   : > { %v1083_v2 = vmax.f32 %v1076_v16, %v1073_v48 }
 0x26e   : > { %v1084_v3 = vmax.f32 %v1076_v16, %v1074_v53 }
 0x26f   : > { %v1092_v8 = vmin.f32 %v1085_v19, %v1083_v2 }
 0x270   : > { %v1093_v9 = vmin.f32 %v1085_v19, %v1084_v3  ;;  %v1290_v19 = vstv %s1289_s26 }
 0x271   : > { %v3219_v11 = vsub.f32 %v1073_v48, %v1092_v8 }
 0x272   : > { %v3221_v12 = vsub.f32 %v1074_v53, %v1093_v9 }
 0x273   : > { %1240 = vmatmul.f32.vlgmr.msrb.gmra.mxu2 %v3219_v11 }
 0x274   : > { %1260 = vmatmul.f32.vlgmr.msrb.gmra.mxu3 %v3221_v12 }
 0x29e   : > { %v1121_v15 = vpop.f32.mrf.mxu0 }
 0x29f   : > { %v1141_v63 = vpop.f32.mrf.mxu1  ;;  %v1264_v42 = vsub.f32 %v1121_v15, %v3732_v22 }
 0x2a0   : > { %v1265_v16 = vsub.f32 %v1141_v63, %v3733_v24 }
 0x2a1   : > { %v1273_v17 = vmul.f32 %v1272_v7, %v1264_v42 }
 0x2a2   : > { %v1274_v18 = vmul.f32 %v1272_v7, %v1265_v16 }
 0x2a3   : > { %v1281_v21 = vsub.f32 %v3189_v27, %v1273_v17 }
 0x2a4   : > { %v1282_v23 = vsub.f32 %v3191_v29, %v1274_v18 }
 0x2a5   : > { %v1291_v26 = vmax.f32 %v1290_v19, %v1281_v21 }
 0x2a6   : > { %v1292_v30 = vmax.f32 %v1290_v19, %v1282_v23 }
 0x2a7   : > { %v1300_v32 = vmin.f32 %v1299_v25, %v1291_v26 }
 0x2a8   : > { %v1301_v33 = vmin.f32 %v1299_v25, %v1292_v30 }
 0x2a9   : > { %v1308_v36 = vsub.f32 %v1281_v21, %v1300_v32 }
 0x2aa   : > { %v1309_v41 = vsub.f32 %v1282_v23, %v1301_v33 }
 0x2ab   : > { %1316 = vst [vmem:[%s3230_s8] sm:$0x1] %v1308_v36 }
 0x2ac   : > { %1317 = vst [vmem:[%s3230_s8 + $0x1] sm:$0x1] %v1309_v41 }
 0x2b8   : > { %v1161_v22 = vpop.f32.mrf.mxu2  ;;  %v1181_v24 = vpop.f32.mrf.mxu3 }
 0x2b9   : > { %v1266_v34 = vsub.f32 %v1161_v22, %v2782_v38  ;;  %v1267_v27 = vsub.f32 %v1181_v24, %v2785_v39 }
 0x2bb   : > { %v1275_v29 = vmul.f32 %v1272_v7, %v1266_v34  ;;  %v1276_v35 = vmul.f32 %v1272_v7, %v1267_v27 }
 0x2bd   : > { %v1283_v51 = vsub.f32 %v3199_v55, %v1275_v29  ;;  %v1284_v44 = vsub.f32 %v3201_v62, %v1276_v35 }
 0x2bf   : > { %v1293_v49 = vmax.f32 %v1290_v19, %v1283_v51  ;;  %v1294_v20 = vmax.f32 %v1290_v19, %v1284_v44 }
 0x2c1   : > { %v1302_v45 = vmin.f32 %v1299_v25, %v1293_v49  ;;  %v1303_v58 = vmin.f32 %v1299_v25, %v1294_v20 }
 0x2c3   : > { %v1310_v39 = vsub.f32 %v1283_v51, %v1302_v45  ;;  %v1311_v57 = vsub.f32 %v1284_v44, %v1303_v58 }
 0x2c5   : > { %1318 = vst [vmem:[%s3230_s8 + $0x2] sm:$0x1] %v1310_v39 }
 0x2c6   : > { %1319 = vst [vmem:[%s3230_s8 + $0x3] sm:$0x1] %v1311_v57 }
 0x2db   : > { %v1201_v59 = vpop.f32.mrf.mxu0 }
 0x2dc   : > { %v1268_v4 = vsub.f32 %v1201_v59, %v2844_v0 }
 0x2dd   : > { %v1221_v5 = vpop.f32.mrf.mxu1 }
 0x2de   : > { %v1269_v38 = vsub.f32 %v1221_v5, %v2847_v1  ;;  %v1277_v6 = vmul.f32 %v1272_v7, %v1268_v4 }
 0x2e0   : > { %v1278_v56 = vmul.f32 %v1272_v7, %v1269_v38  ;;  %v1285_v55 = vsub.f32 %v3209_v61, %v1277_v6 }
 0x2e2   : > { %v1286_v62 = vsub.f32 %v3211_v46, %v1278_v56  ;;  %v1295_v50 = vmax.f32 %v1290_v19, %v1285_v55 }
 0x2e4   : > { %v1296_v47 = vmax.f32 %v1290_v19, %v1286_v62  ;;  %v1304_v54 = vmin.f32 %v1299_v25, %v1295_v50 }
 0x2e6   : > { %v1305_v28 = vmin.f32 %v1299_v25, %v1296_v47  ;;  %v1312_v0 = vsub.f32 %v1285_v55, %v1304_v54 }
 0x2e8   : > { %v1313_v60 = vsub.f32 %v1286_v62, %v1305_v28  ;;  %1320 = vst [vmem:[%s3230_s8 + $0x4] sm:$0x1] %v1312_v0 }
 0x2ea   : > { %1321 = vst [vmem:[%s3230_s8 + $0x5] sm:$0x1] %v1313_v60 }
 0x2f6   : > { %v1241_v1 = vpop.f32.mrf.mxu2 }
 0x2f7   : > { %v1261_v31 = vpop.f32.mrf.mxu3  ;;  %v1270_v37 = vsub.f32 %v1241_v1, %v2870_v13 }
 0x2f8   : > { %v1271_v40 = vsub.f32 %v1261_v31, %v2873_v14 }
 0x2f9   : > { %v1279_v61 = vmul.f32 %v1272_v7, %v1270_v37 }
 0x2fa   : > { %v1280_v46 = vmul.f32 %v1272_v7, %v1271_v40 }
 0x2fb   : > { %v1287_v43 = vsub.f32 %v3219_v11, %v1279_v61 }
 0x2fc   : > { %v1288_v52 = vsub.f32 %v3221_v12, %v1280_v46 }
 0x2fd   : > { %v1297_v10 = vmax.f32 %v1290_v19, %v1287_v43 }
 0x2fe   : > { %v1298_v48 = vmax.f32 %v1290_v19, %v1288_v52 }
 0x2ff   : > { %v1306_v13 = vmin.f32 %v1299_v25, %v1297_v10 }
 0x300   : > { %v1307_v14 = vmin.f32 %v1299_v25, %v1298_v48 }
 0x301   : > { %v1314_v53 = vsub.f32 %v1287_v43, %v1306_v13 }
 0x302   : > { %v1315_v2 = vsub.f32 %v1288_v52, %v1307_v14 }
 0x303   : > { %1322 = vst [vmem:[%s3230_s8 + $0x6] sm:$0x1] %v1314_v53 }
 0x304   : > { %1323 = vst [vmem:[%s3230_s8 + $0x7] sm:$0x1] %v1315_v2 }
 0x305   : > { %1831 = shalt.err (!%p1828_p5)
}
 0x306   : > { %s1885_s10 = smov 16   ;;  %s1886_s20 = smov 1  }
 0x307   : > { %1508 = dma.vmem_to_hbm [thread:$0]  (%p2003_p11), %s1337_s12, 128, %s1339_s13, %s1325_s28, %s1885_s10, %s1885_s10, %s1886_s20  }
 0x308 PF: > { %s1353_s7 = sand.u32 1, %s1866_s15   ;;  %p3734_p7 = scmp.ge.s32.totalorder %s1878_s18, 2 }
 0x309   : > { %s1354_s22 = scalar_lea.sflag [#allocation4], %s1353_s7 }
 0x30a   : > { %p1525_p10 = pnand %p3734_p7, %p2007_p12 }
 0x30c   : > { %p1526_p13 = pneg %p1525_p10 }
 0x30e   : > { %1861 = dma.done.wait (%p1526_p13), %s1354_s22, 128  }
 0x30f   : > { %1863 = vsyncadd (%p1526_p13), %s1354_s22, 4294967168  ;;  %s3735_s23 = sld [smem:[#allocation15_spill]]  ;;  %p21_p0 = scmp.ge.s32.totalorder %s1933_s19, 4  }
 0x310   : > { %s3736_s15 = smov %s1870_s16  ;;  %s3737_s16 = smov %s1874_s17 }
 0x311   : > { %s3739_s18 = smov %s1933_s19  ;;  %23 = sbr.rel (!%p21_p0) target bundleno = 11 (0xb), region = 110 }
 0x315   : > { %s3738_s17 = smov %s3735_s23 }
 0x316   :  { %1360 = vsyncpa [#allocation3], 1 }
 0x317   :  { %1362 = vsyncpa [#allocation3 + $0x1], 1 }
 0x318   :  { %1363 = vsyncpa [#allocation8], 1 }
 0x319   :  { %1365 = vsyncpa [#allocation8 + $0x1], 1 }
 0x31a   :  { %1366 = vsyncpa [#allocation4], 1 }
 0x31b   :  { %1368 = vsyncpa [#allocation4 + $0x1], 1 }
 0x31c   :  { %1369 = vsyncpa [#allocation5], 1 }
 0x31d   :  { %1371 = vsyncpa [#allocation5 + $0x1], 1 }

</bundles_post_ra>
